<compile_context>
chip_gen: v6e
topology: v6e:2x2x1
jax: 0.10.0
libtpu: 0.0.40
codegen_flags: <defaults>
</compile_context>

<pallas_src>
import math

import numpy as np
import jax
import jax.numpy as jnp
from jax import lax
from jax.experimental import pallas as pl
from jax.experimental.pallas import tpu as pltpu

# ---------------- synthetic small Fuyu / Persimmon config --------------------
NUM_LAYERS = 2
HIDDEN = 32
NUM_HEADS = 4
HEAD_DIM = HIDDEN // NUM_HEADS          # 8
INTERMEDIATE = 4 * HIDDEN               # 128
ROT_DIM = HEAD_DIM // 2                 # partial_rotary_factor = 0.5 -> 4
ROPE_THETA = 25000.0                    # Persimmon rope_theta
LN_EPS = 1e-5
BATCH = 2
SEQ = 8
PAST = 8                                # past_key_values length
TOTAL = PAST + SEQ
BS = BATCH * SEQ                        # batch folded into sublanes


# ----------------------- small constant helper matrices -----------------------
def _rope_rotation_matrix():
    """R such that (x @ R)[:, base+j] == rotate_half(x_rot)[:, j] on the first
    ROT_DIM columns of every head (zero elsewhere)."""
    r = np.zeros((HIDDEN, HIDDEN), np.float32)
    half = ROT_DIM // 2
    for head in range(NUM_HEADS):
        base = head * HEAD_DIM
        for j in range(half):
            r[base + j + half, base + j] = -1.0
        for j in range(half, ROT_DIM):
            r[base + j - half, base + j] = 1.0
    return r


def _head_segment_matrix():
    """(HIDDEN, NUM_HEADS) indicator: column c belongs to head c // HEAD_DIM."""
    seg = np.zeros((HIDDEN, NUM_HEADS), np.float32)
    for c in range(HIDDEN):
        seg[c, c // HEAD_DIM] = 1.0
    return seg


# --------------------------- in-kernel math helpers ----------------------------
def _layernorm(x, gamma, beta):
    mu = jnp.mean(x, axis=-1, keepdims=True)
    var = jnp.mean((x - mu) ** 2, axis=-1, keepdims=True)
    return (x - mu) * lax.rsqrt(var + LN_EPS) * gamma + beta


# ------------------------------ fused kernel -----------------------------------
def _fused_decoder_kernel(
    # grid-invariant inputs
    x_ref, mask_ref, cos_ref, sin_ref, rot_ref, seg_ref, segt_ref,
    fin_g_ref, fin_b_ref,
    # per-layer stacked weights (layer axis squeezed by BlockSpec)
    ln1_g_ref, ln1_b_ref, w_qkv_ref, b_qkv_ref,
    qln_g_ref, qln_b_ref, kln_g_ref, kln_b_ref,
    w_dense_ref, b_dense_ref, ln2_g_ref, ln2_b_ref,
    w_fc1_ref, b_fc1_ref, w_fc2_ref, b_fc2_ref,
    # lane-dense past KV for this layer: (B, PAST, HIDDEN)
    past_k_ref, past_v_ref,
    # outputs
    hid_out_ref, k_out_ref, v_out_ref,
    # VMEM scratch: hidden-state carry across layers
    hid_scr,
):
    layer = pl.program_id(0)

    @pl.when(layer == 0)
    def _init():
        hid_scr[...] = x_ref[...]

    hidden = hid_scr[...]                                    # (BS, HIDDEN)

    # ------------------------------ attention --------------------------------
    x = _layernorm(hidden, ln1_g_ref[...], ln1_b_ref[...])
    qkv = jnp.dot(x, w_qkv_ref[...],
                  preferred_element_type=jnp.float32) + b_qkv_ref[...]
    # NOTE / TODO(synk): synthetic weights are packed [Q | K | V] with
    # contiguous heads; real HF Persimmon checkpoints interleave per-head
    # [q_h, k_h, v_h] columns and need a host-side permutation first.
    q_raw = qkv[:, :HIDDEN]
    k_raw = qkv[:, HIDDEN:2 * HIDDEN]
    v = qkv[:, 2 * HIDDEN:]

    # Per-head LayerNorm stats for q and k computed once on a stacked
    # (2*BS, HIDDEN) operand via lane-dense segment matmuls.
    seg = seg_ref[...]
    seg_t = segt_ref[...]
    qk = jnp.concatenate([q_raw, k_raw], axis=0)             # (2*BS, HIDDEN)
    inv_hd = 1.0 / HEAD_DIM
    mean = jnp.dot(jnp.dot(qk, seg, preferred_element_type=jnp.float32) * inv_hd,
                   seg_t, preferred_element_type=jnp.float32)
    cen = qk - mean
    var = jnp.dot(jnp.dot(cen * cen, seg, preferred_element_type=jnp.float32) * inv_hd,
                  seg_t, preferred_element_type=jnp.float32)
    qk_n = cen * lax.rsqrt(var + LN_EPS)
    q_n = qk_n[:BS] * qln_g_ref[...] + qln_b_ref[...]
    k_n = qk_n[BS:] * kln_g_ref[...] + kln_b_ref[...]
    qk_ln = jnp.concatenate([q_n, k_n], axis=0)              # (2*BS, HIDDEN)

    # Partial RoPE, one rotation matmul for q and k together.  The softmax
    # scale 1/sqrt(HEAD_DIM) is folded into the q-half cos/sin tables.
    qk_rot = (qk_ln * cos_ref[...]
              + jnp.dot(qk_ln, rot_ref[...],
                        preferred_element_type=jnp.float32) * sin_ref[...])
    q = qk_rot[:BS]                                          # already scaled
    k = qk_rot[BS:]

    # Per-batch lane-dense presents + per-(batch, head) score tiles.
    score_tiles = []
    v_presents = []
    for b in range(BATCH):                                   # static unroll
        r0 = b * SEQ
        k_present = jnp.concatenate([past_k_ref[b], k[r0:r0 + SEQ]], axis=0)
        v_present = jnp.concatenate([past_v_ref[b], v[r0:r0 + SEQ]], axis=0)
        k_out_ref[b] = k_present                             # single dense store
        v_out_ref[b] = v_present
        v_presents.append(v_present)
        q_b = q[r0:r0 + SEQ]
        for h in range(NUM_HEADS):
            c0 = h * HEAD_DIM
            score_tiles.append(lax.dot_general(
                q_b[:, c0:c0 + HEAD_DIM], k_present[:, c0:c0 + HEAD_DIM],
                (((1,), (1,)), ((), ())), preferred_element_type=jnp.float32))

    # One fp32 softmax over all (batch, head) tiles.
    s = jnp.concatenate(score_tiles, axis=0) + mask_ref[...]  # (B*NH*SEQ, TOTAL)
    s = s - jnp.max(s, axis=-1, keepdims=True)
    e = jnp.exp(s)
    p = e * pl.reciprocal(jnp.sum(e, axis=-1, keepdims=True), approx=True)

    attn_rows = []
    for b in range(BATCH):
        head_outs = []
        for h in range(NUM_HEADS):
            c0 = h * HEAD_DIM
            r0 = (b * NUM_HEADS + h) * SEQ
            head_outs.append(jnp.dot(p[r0:r0 + SEQ],
                                     v_presents[b][:, c0:c0 + HEAD_DIM],
                                     preferred_element_type=jnp.float32))
        attn_rows.append(jnp.concatenate(head_outs, axis=-1))  # (SEQ, HIDDEN)
    attn = jnp.concatenate(attn_rows, axis=0)                  # (BS, HIDDEN)
    attn = jnp.dot(attn, w_dense_ref[...],
                   preferred_element_type=jnp.float32) + b_dense_ref[...]
    hidden = hidden + attn

    # --------------------------------- MLP ------------------------------------
    x = _layernorm(hidden, ln2_g_ref[...], ln2_b_ref[...])
    h1 = jnp.dot(x, w_fc1_ref[...],
                 preferred_element_type=jnp.float32) + b_fc1_ref[...]
    h1 = jnp.maximum(h1, 0.0)
    h1 = h1 * h1                                             # relu^2
    h2 = jnp.dot(h1, w_fc2_ref[...],
                 preferred_element_type=jnp.float32) + b_fc2_ref[...]
    hidden = hidden + h2

    hid_scr[...] = hidden                                    # carry to next layer

    @pl.when(layer == pl.num_programs(0) - 1)
    def _finalize():
        hid_out_ref[...] = _layernorm(hidden, fin_g_ref[...], fin_b_ref[...])


# --------------------------------- JAX glue ------------------------------------
def prepare_causal_mask(attention_mask, seq_len, past_len, dtype=jnp.float32):
    """HF _prepare_4d_causal_attention_mask, returned as (B, S, T) additive."""
    min_val = jnp.asarray(jnp.finfo(dtype).min, dtype)
    t = attention_mask.shape[1]
    q_pos = jnp.arange(seq_len)[:, None] + past_len
    k_pos = jnp.arange(t)[None, :]
    causal = k_pos <= q_pos                                  # (S, T)
    pad_ok = attention_mask[:, None, :] > 0                  # (B, 1, T)
    allowed = causal[None, :, :] & pad_ok                    # (B, S, T)
    return jnp.where(allowed, jnp.asarray(0.0, dtype), min_val)


def rotary_cos_sin(position_ids, rot_dim, theta):
    inv_freq = 1.0 / (theta ** (jnp.arange(0, rot_dim, 2, dtype=jnp.float32) / rot_dim))
    pos = position_ids.astype(jnp.float32).reshape(-1)       # (S,)
    freqs = pos[:, None] * inv_freq[None, :]                 # (S, rot/2)
    emb = jnp.concatenate([freqs, freqs], axis=-1)           # (S, rot)
    return jnp.cos(emb), jnp.sin(emb)


def fuyu_txt_decoder_forward(params, inputs_embeds, attention_mask, position_ids,
                             *past_key_values):
    b, s, h = inputs_embeds.shape
    past_len = past_key_values[0].shape[-2]
    t = past_len + s
    bs = b * s

    # additive mask, tiled over heads and flattened to match in-kernel stacking
    mask3d = prepare_causal_mask(attention_mask, s, past_len)            # (B, S, T)
    mask_flat = jnp.tile(mask3d[:, None, :, :],
                         (1, NUM_HEADS, 1, 1)).reshape(b * NUM_HEADS * s, t)

    position_ids = position_ids.reshape(1, -1)                           # (1, S)
    cos, sin = rotary_cos_sin(position_ids, ROT_DIM, ROPE_THETA)         # (S, ROT)
    cos_head = jnp.tile(
        jnp.concatenate([cos, jnp.ones((s, HEAD_DIM - ROT_DIM), jnp.float32)], -1),
        (1, NUM_HEADS))                                                  # (S, H)
    sin_head = jnp.tile(
        jnp.concatenate([sin, jnp.zeros((s, HEAD_DIM - ROT_DIM), jnp.float32)], -1),
        (1, NUM_HEADS))
    scale = 1.0 / math.sqrt(HEAD_DIM)
    # stacked [q-rows ; k-rows] tables; softmax scale folded into the q half
    cos_qk = jnp.concatenate([jnp.tile(cos_head, (b, 1)) * scale,
                              jnp.tile(cos_head, (b, 1))], axis=0)       # (2*BS, H)
    sin_qk = jnp.concatenate([jnp.tile(sin_head, (b, 1)) * scale,
                              jnp.tile(sin_head, (b, 1))], axis=0)

    rot_mat = jnp.asarray(_rope_rotation_matrix())                       # (H, H)
    seg = jnp.asarray(_head_segment_matrix())                            # (H, NH)
    seg_t = seg.T                                                        # (NH, H)

    lay = params["layers"]

    def stack2(name):                       # (L, d0, d1)
        return jnp.stack([l_[name] for l_ in lay])

    def stack_row(name, tile_heads=False):  # (L, 1, width)
        rows = []
        for l_ in lay:
            a = l_[name]
            if tile_heads:
                a = jnp.tile(a, (NUM_HEADS,))
            rows.append(a.reshape(1, -1))
        return jnp.stack(rows)

    ln1_g, ln1_b = stack_row("ln1_g"), stack_row("ln1_b")
    w_qkv, b_qkv = stack2("w_qkv"), stack_row("b_qkv")
    qln_g, qln_b = stack_row("qln_g", True), stack_row("qln_b", True)
    kln_g, kln_b = stack_row("kln_g", True), stack_row("kln_b", True)
    w_dense, b_dense = stack2("w_dense"), stack_row("b_dense")
    ln2_g, ln2_b = stack_row("ln2_g"), stack_row("ln2_b")
    w_fc1, b_fc1 = stack2("w_fc1"), stack_row("b_fc1")
    w_fc2, b_fc2 = stack2("w_fc2"), stack_row("b_fc2")
    fin_g = params["final_g"].reshape(1, h)
    fin_b = params["final_b"].reshape(1, h)

    # past KV in lane-dense layout (L, B, PAST, HIDDEN)
    def dense_past(slices):
        arr = jnp.stack(list(slices))                        # (L, B, NH, P, hd)
        return arr.transpose(0, 1, 3, 2, 4).reshape(NUM_LAYERS, b, past_len, h)

    past_k = dense_past(past_key_values[0::2])
    past_v = dense_past(past_key_values[1::2])

    x_flat = inputs_embeds.reshape(bs, h)

    def gspec(*shape):                      # grid-invariant (resident) input
        zeros = (0,) * len(shape)
        return pl.BlockSpec(shape, lambda li: zeros)

    def lspec(*shape):                      # layer-indexed, leading dim squeezed
        zeros = (0,) * len(shape)
        return pl.BlockSpec((None,) + shape, lambda li: (li,) + zeros)

    args_specs = [
        (x_flat,    gspec(bs, h)),
        (mask_flat, gspec(b * NUM_HEADS * s, t)),
        (cos_qk,    gspec(2 * bs, h)),
        (sin_qk,    gspec(2 * bs, h)),
        (rot_mat,   gspec(h, h)),
        (seg,       gspec(h, NUM_HEADS)),
        (seg_t,     gspec(NUM_HEADS, h)),
        (fin_g,     gspec(1, h)),
        (fin_b,     gspec(1, h)),
        (ln1_g, lspec(1, h)), (ln1_b, lspec(1, h)),
        (w_qkv, lspec(h, 3 * h)), (b_qkv, lspec(1, 3 * h)),
        (qln_g, lspec(1, h)), (qln_b, lspec(1, h)),
        (kln_g, lspec(1, h)), (kln_b, lspec(1, h)),
        (w_dense, lspec(h, h)), (b_dense, lspec(1, h)),
        (ln2_g, lspec(1, h)), (ln2_b, lspec(1, h)),
        (w_fc1, lspec(h, INTERMEDIATE)), (b_fc1, lspec(1, INTERMEDIATE)),
        (w_fc2, lspec(INTERMEDIATE, h)), (b_fc2, lspec(1, h)),
        (past_k, lspec(b, past_len, h)),
        (past_v, lspec(b, past_len, h)),
    ]
    arrays = [a for a, _ in args_specs]
    in_specs = [sp for _, sp in args_specs]

    out_shape = (
        jax.ShapeDtypeStruct((bs, h), jnp.float32),
        jax.ShapeDtypeStruct((NUM_LAYERS, b, t, h), jnp.float32),
        jax.ShapeDtypeStruct((NUM_LAYERS, b, t, h), jnp.float32),
    )
    out_specs = (
        gspec(bs, h),
        lspec(b, t, h),
        lspec(b, t, h),
    )

    hid_flat, out_k, out_v = pl.pallas_call(
        _fused_decoder_kernel,
        grid_spec=pltpu.PrefetchScalarGridSpec(
            num_scalar_prefetch=0,
            grid=(NUM_LAYERS,),
            in_specs=in_specs,
            out_specs=out_specs,
            scratch_shapes=[pltpu.VMEM((bs, h), jnp.float32)],   # hidden carry
        ),
        out_shape=out_shape,
        compiler_params=pltpu.CompilerParams(
            dimension_semantics=("arbitrary",)),
    )(*arrays)

    hidden_out = hid_flat.reshape(b, s, h)
    # reshape lane-dense presents back to the module's (B, NH, T, hd) contract
    out_k = out_k.reshape(NUM_LAYERS, b, t, NUM_HEADS, HEAD_DIM).transpose(0, 1, 3, 2, 4)
    out_v = out_v.reshape(NUM_LAYERS, b, t, NUM_HEADS, HEAD_DIM).transpose(0, 1, 3, 2, 4)
    presents = tuple((out_k[i], out_v[i]) for i in range(NUM_LAYERS))
    return (hidden_out, *presents)


# ------------------------ pure-JAX reference (for check) -----------------------
def _reference_forward(params, inputs_embeds, attention_mask, position_ids,
                       *past_key_values):
    b, s, h = inputs_embeds.shape
    past_len = past_key_values[0].shape[-2]
    mask4d = prepare_causal_mask(attention_mask, s, past_len)[:, None]   # (B,1,S,T)
    cos, sin = rotary_cos_sin(position_ids.reshape(1, -1), ROT_DIM, ROPE_THETA)

    def ln(x, g, bta):
        mu = jnp.mean(x, -1, keepdims=True)
        var = jnp.mean((x - mu) ** 2, -1, keepdims=True)
        return (x - mu) * lax.rsqrt(var + LN_EPS) * g + bta

    def rot_half(x):
        hh = x.shape[-1] // 2
        return jnp.concatenate([-x[..., hh:], x[..., :hh]], -1)

    hidden = inputs_embeds
    presents = []
    for i in range(NUM_LAYERS):
        p = params["layers"][i]
        pk, pv = past_key_values[2 * i], past_key_values[2 * i + 1]
        residual = hidden
        x = ln(hidden, p["ln1_g"], p["ln1_b"])
        qkv = jnp.einsum("bsh,hk->bsk", x, p["w_qkv"]) + p["b_qkv"]
        q, k, v = qkv[..., :h], qkv[..., h:2 * h], qkv[..., 2 * h:]
        q = ln(q.reshape(b, s, NUM_HEADS, HEAD_DIM), p["qln_g"], p["qln_b"])
        k = ln(k.reshape(b, s, NUM_HEADS, HEAD_DIM), p["kln_g"], p["kln_b"])
        v = v.reshape(b, s, NUM_HEADS, HEAD_DIM)
        q = q.transpose(0, 2, 1, 3)
        k = k.transpose(0, 2, 1, 3)
        v = v.transpose(0, 2, 1, 3)
        q_rot, q_pass = q[..., :ROT_DIM], q[..., ROT_DIM:]
        k_rot, k_pass = k[..., :ROT_DIM], k[..., ROT_DIM:]
        cs, sn = cos[None, None], sin[None, None]
        q = jnp.concatenate([q_rot * cs + rot_half(q_rot) * sn, q_pass], -1)
        k = jnp.concatenate([k_rot * cs + rot_half(k_rot) * sn, k_pass], -1)
        k_full = jnp.concatenate([pk, k], axis=2)
        v_full = jnp.concatenate([pv, v], axis=2)
        sc = jnp.einsum("bnqd,bnkd->bnqk", q, k_full) / math.sqrt(HEAD_DIM) + mask4d
        sc = jax.nn.softmax(sc, axis=-1)
        att = jnp.einsum("bnqk,bnkd->bnqd", sc, v_full)
        att = att.transpose(0, 2, 1, 3).reshape(b, s, h)
        att = jnp.einsum("bsh,hk->bsk", att, p["w_dense"]) + p["b_dense"]
        hidden = residual + att
        residual = hidden
        x = ln(hidden, p["ln2_g"], p["ln2_b"])
        h1 = jnp.maximum(jnp.einsum("bsh,hk->bsk", x, p["w_fc1"]) + p["b_fc1"], 0.0) ** 2
        h2 = jnp.einsum("bsk,kh->bsh", h1, p["w_fc2"]) + p["b_fc2"]
        hidden = residual + h2
        presents.append((k_full, v_full))
    hidden = ln(hidden, params["final_g"], params["final_b"])
    return (hidden, *presents)


# ---------------------------- parameter init ----------------------------------
def init_params(key):
    def nrm(k, shape, scale=0.02):
        return scale * jax.random.normal(k, shape, dtype=jnp.float32)

    layers = []
    for i in range(NUM_LAYERS):
        ks = jax.random.split(jax.random.fold_in(key, i), 8)
        layers.append({
            "ln1_g": jnp.ones((HIDDEN,), jnp.float32),
            "ln1_b": jnp.zeros((HIDDEN,), jnp.float32),
            "w_qkv": nrm(ks[0], (HIDDEN, 3 * HIDDEN)),
            "b_qkv": nrm(ks[1], (3 * HIDDEN,)),
            "qln_g": jnp.ones((HEAD_DIM,), jnp.float32),
            "qln_b": jnp.zeros((HEAD_DIM,), jnp.float32),
            "kln_g": jnp.ones((HEAD_DIM,), jnp.float32),
            "kln_b": jnp.zeros((HEAD_DIM,), jnp.float32),
            "w_dense": nrm(ks[2], (HIDDEN, HIDDEN)),
            "b_dense": nrm(ks[3], (HIDDEN,)),
            "ln2_g": jnp.ones((HIDDEN,), jnp.float32),
            "ln2_b": jnp.zeros((HIDDEN,), jnp.float32),
            "w_fc1": nrm(ks[4], (HIDDEN, INTERMEDIATE)),
            "b_fc1": nrm(ks[5], (INTERMEDIATE,)),
            "w_fc2": nrm(ks[6], (INTERMEDIATE, HIDDEN)),
            "b_fc2": nrm(ks[7], (HIDDEN,)),
        })
    return {
        "layers": layers,
        "final_g": jnp.ones((HIDDEN,), jnp.float32),
        "final_b": jnp.zeros((HIDDEN,), jnp.float32),
    }


# ----------------------------------- main --------------------------------------
if __name__ == "__main__":
    key = jax.random.PRNGKey(0)
    kx, kk, kp = jax.random.split(key, 3)

    params = init_params(kp)
    inputs_embeds = jax.random.normal(kx, (BATCH, SEQ, HIDDEN), dtype=jnp.float32)
    attention_mask = jnp.ones((BATCH, PAST + SEQ), dtype=jnp.int32)
    position_ids = jnp.arange(PAST, PAST + SEQ, dtype=jnp.int32)

    past_key_values = []
    for i in range(NUM_LAYERS):
        k1, k2 = jax.random.split(jax.random.fold_in(kk, i))
        past_key_values.append(
            0.1 * jax.random.normal(k1, (BATCH, NUM_HEADS, PAST, HEAD_DIM), jnp.float32))
        past_key_values.append(
            0.1 * jax.random.normal(k2, (BATCH, NUM_HEADS, PAST, HEAD_DIM), jnp.float32))

    forward = jax.jit(fuyu_txt_decoder_forward)
    outputs = forward(params, inputs_embeds, attention_mask, position_ids,
                      *past_key_values)
    jax.block_until_ready(jax.tree_util.tree_leaves(outputs))

    hidden_out = outputs[0]
    assert hidden_out.shape == (BATCH, SEQ, HIDDEN)
    for (kf, vf) in outputs[1:]:
        assert kf.shape == (BATCH, NUM_HEADS, PAST + SEQ, HEAD_DIM)
        assert vf.shape == (BATCH, NUM_HEADS, PAST + SEQ, HEAD_DIM)

    # numerical check against a pure-JAX mirror of the module semantics
    ref = _reference_forward(params, inputs_embeds, attention_mask, position_ids,
                             *past_key_values)
    np.testing.assert_allclose(np.asarray(hidden_out), np.asarray(ref[0]),
                               atol=2e-3, rtol=2e-2)
    for (kf, vf), (rk, rv) in zip(outputs[1:], ref[1:]):
        np.testing.assert_allclose(np.asarray(kf), np.asarray(rk), atol=2e-3, rtol=2e-2)
        np.testing.assert_allclose(np.asarray(vf), np.asarray(rv), atol=2e-3, rtol=2e-2)

    print("KERNEL_OK")
</pallas_src>

<mosaic_0001>
module attributes {stable_mosaic.version = 11 : i64} {
  func.func @_fused_decoder_kernel(%arg0: i32, %arg1: memref<16x32xf32, #tpu.memory_space<vmem>>, %arg2: memref<64x16xf32, #tpu.memory_space<vmem>>, %arg3: memref<32x32xf32, #tpu.memory_space<vmem>>, %arg4: memref<32x32xf32, #tpu.memory_space<vmem>>, %arg5: memref<32x32xf32, #tpu.memory_space<vmem>>, %arg6: memref<32x4xf32, #tpu.memory_space<vmem>>, %arg7: memref<4x32xf32, #tpu.memory_space<vmem>>, %arg8: memref<1x32xf32, #tpu.memory_space<vmem>>, %arg9: memref<1x32xf32, #tpu.memory_space<vmem>>, %arg10: memref<1x1x32xf32, #tpu.memory_space<vmem>>, %arg11: memref<1x1x32xf32, #tpu.memory_space<vmem>>, %arg12: memref<1x32x96xf32, #tpu.memory_space<vmem>>, %arg13: memref<1x1x96xf32, #tpu.memory_space<vmem>>, %arg14: memref<1x1x32xf32, #tpu.memory_space<vmem>>, %arg15: memref<1x1x32xf32, #tpu.memory_space<vmem>>, %arg16: memref<1x1x32xf32, #tpu.memory_space<vmem>>, %arg17: memref<1x1x32xf32, #tpu.memory_space<vmem>>, %arg18: memref<1x32x32xf32, #tpu.memory_space<vmem>>, %arg19: memref<1x1x32xf32, #tpu.memory_space<vmem>>, %arg20: memref<1x1x32xf32, #tpu.memory_space<vmem>>, %arg21: memref<1x1x32xf32, #tpu.memory_space<vmem>>, %arg22: memref<1x32x128xf32, #tpu.memory_space<vmem>>, %arg23: memref<1x1x128xf32, #tpu.memory_space<vmem>>, %arg24: memref<1x128x32xf32, #tpu.memory_space<vmem>>, %arg25: memref<1x1x32xf32, #tpu.memory_space<vmem>>, %arg26: memref<1x2x8x32xf32, #tpu.memory_space<vmem>>, %arg27: memref<1x2x8x32xf32, #tpu.memory_space<vmem>>, %arg28: memref<16x32xf32, #tpu.memory_space<vmem>>, %arg29: memref<1x2x16x32xf32, #tpu.memory_space<vmem>>, %arg30: memref<1x2x16x32xf32, #tpu.memory_space<vmem>>, %arg31: memref<16x32xf32, #tpu.memory_space<vmem>>) attributes {dimension_semantics = [#tpu.dimension_semantics<arbitrary>], iteration_bounds = array<i64: 2>, scalar_prefetch = 0 : i64, scratch_operands = 1 : i64, tpu.core_type = #tpu.core_type<tc>, window_params = [{pipeline_mode = #tpu.pipeline_mode<synchronous>, transform_indices = @transform_0, window_bounds = array<i64: 16, 32>}, {pipeline_mode = #tpu.pipeline_mode<synchronous>, transform_indices = @transform_1, window_bounds = array<i64: 64, 16>}, {pipeline_mode = #tpu.pipeline_mode<synchronous>, transform_indices = @transform_2, window_bounds = array<i64: 32, 32>}, {pipeline_mode = #tpu.pipeline_mode<synchronous>, transform_indices = @transform_3, window_bounds = array<i64: 32, 32>}, {pipeline_mode = #tpu.pipeline_mode<synchronous>, transform_indices = @transform_4, window_bounds = array<i64: 32, 32>}, {pipeline_mode = #tpu.pipeline_mode<synchronous>, transform_indices = @transform_5, window_bounds = array<i64: 32, 4>}, {pipeline_mode = #tpu.pipeline_mode<synchronous>, transform_indices = @transform_6, window_bounds = array<i64: 4, 32>}, {pipeline_mode = #tpu.pipeline_mode<synchronous>, transform_indices = @transform_7, window_bounds = array<i64: 1, 32>}, {pipeline_mode = #tpu.pipeline_mode<synchronous>, transform_indices = @transform_8, window_bounds = array<i64: 1, 32>}, {transform_indices = @transform_9, window_bounds = array<i64: 1, 1, 32>}, {transform_indices = @transform_10, window_bounds = array<i64: 1, 1, 32>}, {transform_indices = @transform_11, window_bounds = array<i64: 1, 32, 96>}, {transform_indices = @transform_12, window_bounds = array<i64: 1, 1, 96>}, {transform_indices = @transform_13, window_bounds = array<i64: 1, 1, 32>}, {transform_indices = @transform_14, window_bounds = array<i64: 1, 1, 32>}, {transform_indices = @transform_15, window_bounds = array<i64: 1, 1, 32>}, {transform_indices = @transform_16, window_bounds = array<i64: 1, 1, 32>}, {transform_indices = @transform_17, window_bounds = array<i64: 1, 32, 32>}, {transform_indices = @transform_18, window_bounds = array<i64: 1, 1, 32>}, {transform_indices = @transform_19, window_bounds = array<i64: 1, 1, 32>}, {transform_indices = @transform_20, window_bounds = array<i64: 1, 1, 32>}, {transform_indices = @transform_21, window_bounds = array<i64: 1, 32, 128>}, {transform_indices = @transform_22, window_bounds = array<i64: 1, 1, 128>}, {transform_indices = @transform_23, window_bounds = array<i64: 1, 128, 32>}, {transform_indices = @transform_24, window_bounds = array<i64: 1, 1, 32>}, {transform_indices = @transform_25, window_bounds = array<i64: 1, 2, 8, 32>}, {transform_indices = @transform_26, window_bounds = array<i64: 1, 2, 8, 32>}, {pipeline_mode = #tpu.pipeline_mode<synchronous>, transform_indices = @transform_27, window_bounds = array<i64: 16, 32>}, {transform_indices = @transform_28, window_bounds = array<i64: 1, 2, 16, 32>}, {transform_indices = @transform_29, window_bounds = array<i64: 1, 2, 16, 32>}]} {
    %c0_i32 = arith.constant 0 : i32
    %0 = arith.cmpi eq, %arg0, %c0_i32 : i32
    %1 = arith.extui %0 : i1 to i32
    %c0_i32_0 = arith.constant 0 : i32
    %2 = arith.cmpi ne, %1, %c0_i32_0 : i32
    scf.if %2 {
      %c0_136 = arith.constant 0 : index
      %c0_137 = arith.constant 0 : index
      %235 = vector.load %arg1[%c0_136, %c0_137] : memref<16x32xf32, #tpu.memory_space<vmem>>, vector<16x32xf32>
      %c0_138 = arith.constant 0 : index
      %c0_139 = arith.constant 0 : index
      %236 = vector.load %arg31[%c0_138, %c0_139] : memref<16x32xf32, #tpu.memory_space<vmem>>, vector<16x32xf32>
      tpu.vector_store %arg31[%c0_138, %c0_139], %235 {strides = array<i32>} : memref<16x32xf32, #tpu.memory_space<vmem>>, vector<16x32xf32>,
    } else {
    }
    %c0 = arith.constant 0 : index
    %c0_1 = arith.constant 0 : index
    %3 = vector.load %arg31[%c0, %c0_1] : memref<16x32xf32, #tpu.memory_space<vmem>>, vector<16x32xf32>
    %c0_2 = arith.constant 0 : index
    %c0_3 = arith.constant 0 : index
    %c0_4 = arith.constant 0 : index
    %4 = vector.load %arg10[%c0_2, %c0_3, %c0_4] : memref<1x1x32xf32, #tpu.memory_space<vmem>>, vector<1x1x32xf32>
    %5 = vector.shape_cast %4 : vector<1x1x32xf32> to vector<1x32xf32>
    %c0_5 = arith.constant 0 : index
    %c0_6 = arith.constant 0 : index
    %c0_7 = arith.constant 0 : index
    %6 = vector.load %arg11[%c0_5, %c0_6, %c0_7] : memref<1x1x32xf32, #tpu.memory_space<vmem>>, vector<1x1x32xf32>
    %7 = vector.shape_cast %6 : vector<1x1x32xf32> to vector<1x32xf32>
    %cst = arith.constant dense<0.000000e+00> : vector<16xf32>
    %8 = vector.multi_reduction <add>, %3, %cst [1] : vector<16x32xf32> to vector<16xf32>
    %9 = vector.shape_cast %8 : vector<16xf32> to vector<16x1xf32>
    %cst_8 = arith.constant 3.200000e+01 : f32
    %10 = vector.broadcast %cst_8 : f32 to vector<16x1xf32>
    %11 = arith.divf %9, %10 : vector<16x1xf32>
    %12 = vector.broadcast %11 : vector<16x1xf32> to vector<16x32xf32>
    %13 = arith.subf %3, %12 : vector<16x32xf32>
    %14 = arith.mulf %13, %13 : vector<16x32xf32>
    %cst_9 = arith.constant dense<0.000000e+00> : vector<16xf32>
    %15 = vector.multi_reduction <add>, %14, %cst_9 [1] : vector<16x32xf32> to vector<16xf32>
    %16 = vector.shape_cast %15 : vector<16xf32> to vector<16x1xf32>
    %cst_10 = arith.constant 3.200000e+01 : f32
    %17 = vector.broadcast %cst_10 : f32 to vector<16x1xf32>
    %18 = arith.divf %16, %17 : vector<16x1xf32>
    %19 = vector.broadcast %11 : vector<16x1xf32> to vector<16x32xf32>
    %20 = arith.subf %3, %19 : vector<16x32xf32>
    %cst_11 = arith.constant 9.99999974E-6 : f32
    %21 = vector.broadcast %cst_11 : f32 to vector<16x1xf32>
    %22 = arith.addf %18, %21 : vector<16x1xf32>
    %23 = math.rsqrt %22 : vector<16x1xf32>
    %24 = vector.broadcast %23 : vector<16x1xf32> to vector<16x32xf32>
    %25 = arith.mulf %20, %24 : vector<16x32xf32>
    %26 = vector.broadcast %5 : vector<1x32xf32> to vector<16x32xf32>
    %27 = arith.mulf %25, %26 : vector<16x32xf32>
    %28 = vector.broadcast %7 : vector<1x32xf32> to vector<16x32xf32>
    %29 = arith.addf %27, %28 : vector<16x32xf32>
    %c0_12 = arith.constant 0 : index
    %c0_13 = arith.constant 0 : index
    %c0_14 = arith.constant 0 : index
    %30 = vector.load %arg12[%c0_12, %c0_13, %c0_14] : memref<1x32x96xf32, #tpu.memory_space<vmem>>, vector<1x32x96xf32>
    %31 = vector.shape_cast %30 : vector<1x32x96xf32> to vector<32x96xf32>
    %cst_15 = arith.constant dense<0.000000e+00> : vector<16x96xf32>
    %32 = tpu.matmul %29, %31, %cst_15 {dimension_numbers = #tpu.dot_dimension_numbers<[1], [0], [0], [1], [0, 0, 1, 1], [], []>} : vector<16x32xf32>, vector<32x96xf32>, vector<16x96xf32> -> vector<16x96xf32>
    %c0_16 = arith.constant 0 : index
    %c0_17 = arith.constant 0 : index
    %c0_18 = arith.constant 0 : index
    %33 = vector.load %arg13[%c0_16, %c0_17, %c0_18] : memref<1x1x96xf32, #tpu.memory_space<vmem>>, vector<1x1x96xf32>
    %34 = vector.shape_cast %33 : vector<1x1x96xf32> to vector<1x96xf32>
    %35 = vector.broadcast %34 : vector<1x96xf32> to vector<16x96xf32>
    %36 = arith.addf %32, %35 : vector<16x96xf32>
    %37 = vector.extract_strided_slice %36 {offsets = [0, 0], sizes = [16, 32], strides = [1, 1]} : vector<16x96xf32> to vector<16x32xf32>
    %38 = vector.extract_strided_slice %36 {offsets = [0, 32], sizes = [16, 32], strides = [1, 1]} : vector<16x96xf32> to vector<16x32xf32>
    %39 = vector.extract_strided_slice %36 {offsets = [0, 64], sizes = [16, 32], strides = [1, 1]} : vector<16x96xf32> to vector<16x32xf32>
    %c0_19 = arith.constant 0 : index
    %c0_20 = arith.constant 0 : index
    %40 = vector.load %arg6[%c0_19, %c0_20] : memref<32x4xf32, #tpu.memory_space<vmem>>, vector<32x4xf32>
    %c0_21 = arith.constant 0 : index
    %c0_22 = arith.constant 0 : index
    %41 = vector.load %arg7[%c0_21, %c0_22] : memref<4x32xf32, #tpu.memory_space<vmem>>, vector<4x32xf32>
    %42 = tpu.concatenate %37, %38 in 0 : vector<16x32xf32>, vector<16x32xf32> -> vector<32x32xf32>
    %cst_23 = arith.constant dense<0.000000e+00> : vector<32x4xf32>
    %43 = tpu.matmul %42, %40, %cst_23 {dimension_numbers = #tpu.dot_dimension_numbers<[1], [0], [0], [1], [0, 0, 1, 1], [], []>} : vector<32x32xf32>, vector<32x4xf32>, vector<32x4xf32> -> vector<32x4xf32>
    %cst_24 = arith.constant 1.250000e-01 : f32
    %44 = vector.broadcast %cst_24 : f32 to vector<32x4xf32>
    %45 = arith.mulf %43, %44 : vector<32x4xf32>
    %cst_25 = arith.constant dense<0.000000e+00> : vector<32x32xf32>
    %46 = tpu.matmul %45, %41, %cst_25 {dimension_numbers = #tpu.dot_dimension_numbers<[1], [0], [0], [1], [0, 0, 1, 1], [], []>} : vector<32x4xf32>, vector<4x32xf32>, vector<32x32xf32> -> vector<32x32xf32>
    %47 = arith.subf %42, %46 : vector<32x32xf32>
    %48 = arith.mulf %47, %47 : vector<32x32xf32>
    %cst_26 = arith.constant dense<0.000000e+00> : vector<32x4xf32>
    %49 = tpu.matmul %48, %40, %cst_26 {dimension_numbers = #tpu.dot_dimension_numbers<[1], [0], [0], [1], [0, 0, 1, 1], [], []>} : vector<32x32xf32>, vector<32x4xf32>, vector<32x4xf32> -> vector<32x4xf32>
    %cst_27 = arith.constant 1.250000e-01 : f32
    %50 = vector.broadcast %cst_27 : f32 to vector<32x4xf32>
    %51 = arith.mulf %49, %50 : vector<32x4xf32>
    %cst_28 = arith.constant dense<0.000000e+00> : vector<32x32xf32>
    %52 = tpu.matmul %51, %41, %cst_28 {dimension_numbers = #tpu.dot_dimension_numbers<[1], [0], [0], [1], [0, 0, 1, 1], [], []>} : vector<32x4xf32>, vector<4x32xf32>, vector<32x32xf32> -> vector<32x32xf32>
    %cst_29 = arith.constant 9.99999974E-6 : f32
    %53 = vector.broadcast %cst_29 : f32 to vector<32x32xf32>
    %54 = arith.addf %52, %53 : vector<32x32xf32>
    %55 = math.rsqrt %54 : vector<32x32xf32>
    %56 = arith.mulf %47, %55 : vector<32x32xf32>
    %57 = vector.extract_strided_slice %56 {offsets = [0, 0], sizes = [16, 32], strides = [1, 1]} : vector<32x32xf32> to vector<16x32xf32>
    %c0_30 = arith.constant 0 : index
    %c0_31 = arith.constant 0 : index
    %c0_32 = arith.constant 0 : index
    %58 = vector.load %arg14[%c0_30, %c0_31, %c0_32] : memref<1x1x32xf32, #tpu.memory_space<vmem>>, vector<1x1x32xf32>
    %59 = vector.shape_cast %58 : vector<1x1x32xf32> to vector<1x32xf32>
    %60 = vector.broadcast %59 : vector<1x32xf32> to vector<16x32xf32>
    %61 = arith.mulf %57, %60 : vector<16x32xf32>
    %c0_33 = arith.constant 0 : index
    %c0_34 = arith.constant 0 : index
    %c0_35 = arith.constant 0 : index
    %62 = vector.load %arg15[%c0_33, %c0_34, %c0_35] : memref<1x1x32xf32, #tpu.memory_space<vmem>>, vector<1x1x32xf32>
    %63 = vector.shape_cast %62 : vector<1x1x32xf32> to vector<1x32xf32>
    %64 = vector.broadcast %63 : vector<1x32xf32> to vector<16x32xf32>
    %65 = arith.addf %61, %64 : vector<16x32xf32>
    %66 = vector.extract_strided_slice %56 {offsets = [16, 0], sizes = [16, 32], strides = [1, 1]} : vector<32x32xf32> to vector<16x32xf32>
    %c0_36 = arith.constant 0 : index
    %c0_37 = arith.constant 0 : index
    %c0_38 = arith.constant 0 : index
    %67 = vector.load %arg16[%c0_36, %c0_37, %c0_38] : memref<1x1x32xf32, #tpu.memory_space<vmem>>, vector<1x1x32xf32>
    %68 = vector.shape_cast %67 : vector<1x1x32xf32> to vector<1x32xf32>
    %69 = vector.broadcast %68 : vector<1x32xf32> to vector<16x32xf32>
    %70 = arith.mulf %66, %69 : vector<16x32xf32>
    %c0_39 = arith.constant 0 : index
    %c0_40 = arith.constant 0 : index
    %c0_41 = arith.constant 0 : index
    %71 = vector.load %arg17[%c0_39, %c0_40, %c0_41] : memref<1x1x32xf32, #tpu.memory_space<vmem>>, vector<1x1x32xf32>
    %72 = vector.shape_cast %71 : vector<1x1x32xf32> to vector<1x32xf32>
    %73 = vector.broadcast %72 : vector<1x32xf32> to vector<16x32xf32>
    %74 = arith.addf %70, %73 : vector<16x32xf32>
    %75 = tpu.concatenate %65, %74 in 0 : vector<16x32xf32>, vector<16x32xf32> -> vector<32x32xf32>
    %c0_42 = arith.constant 0 : index
    %c0_43 = arith.constant 0 : index
    %76 = vector.load %arg3[%c0_42, %c0_43] : memref<32x32xf32, #tpu.memory_space<vmem>>, vector<32x32xf32>
    %77 = arith.mulf %75, %76 : vector<32x32xf32>
    %c0_44 = arith.constant 0 : index
    %c0_45 = arith.constant 0 : index
    %78 = vector.load %arg5[%c0_44, %c0_45] : memref<32x32xf32, #tpu.memory_space<vmem>>, vector<32x32xf32>
    %cst_46 = arith.constant dense<0.000000e+00> : vector<32x32xf32>
    %79 = tpu.matmul %75, %78, %cst_46 {dimension_numbers = #tpu.dot_dimension_numbers<[1], [0], [0], [1], [0, 0, 1, 1], [], []>} : vector<32x32xf32>, vector<32x32xf32>, vector<32x32xf32> -> vector<32x32xf32>
    %c0_47 = arith.constant 0 : index
    %c0_48 = arith.constant 0 : index
    %80 = vector.load %arg4[%c0_47, %c0_48] : memref<32x32xf32, #tpu.memory_space<vmem>>, vector<32x32xf32>
    %81 = arith.mulf %79, %80 : vector<32x32xf32>
    %82 = arith.addf %77, %81 : vector<32x32xf32>
    %83 = vector.extract_strided_slice %82 {offsets = [0, 0], sizes = [16, 32], strides = [1, 1]} : vector<32x32xf32> to vector<16x32xf32>
    %84 = vector.extract_strided_slice %82 {offsets = [16, 0], sizes = [16, 32], strides = [1, 1]} : vector<32x32xf32> to vector<16x32xf32>
    %c0_49 = arith.constant 0 : index
    %c0_50 = arith.constant 0 : index
    %c0_51 = arith.constant 0 : index
    %c0_52 = arith.constant 0 : index
    %85 = vector.load %arg26[%c0_49, %c0_50, %c0_51, %c0_52] : memref<1x2x8x32xf32, #tpu.memory_space<vmem>>, vector<1x1x8x32xf32>
    %86 = vector.shape_cast %85 : vector<1x1x8x32xf32> to vector<8x32xf32>
    %87 = vector.extract_strided_slice %84 {offsets = [0, 0], sizes = [8, 32], strides = [1, 1]} : vector<16x32xf32> to vector<8x32xf32>
    %88 = tpu.concatenate %86, %87 in 0 : vector<8x32xf32>, vector<8x32xf32> -> vector<16x32xf32>
    %c0_53 = arith.constant 0 : index
    %c0_54 = arith.constant 0 : index
    %c0_55 = arith.constant 0 : index
    %c0_56 = arith.constant 0 : index
    %89 = vector.load %arg27[%c0_53, %c0_54, %c0_55, %c0_56] : memref<1x2x8x32xf32, #tpu.memory_space<vmem>>, vector<1x1x8x32xf32>
    %90 = vector.shape_cast %89 : vector<1x1x8x32xf32> to vector<8x32xf32>
    %91 = vector.extract_strided_slice %39 {offsets = [0, 0], sizes = [8, 32], strides = [1, 1]} : vector<16x32xf32> to vector<8x32xf32>
    %92 = tpu.concatenate %90, %91 in 0 : vector<8x32xf32>, vector<8x32xf32> -> vector<16x32xf32>
    %c0_57 = arith.constant 0 : index
    %c0_58 = arith.constant 0 : index
    %c0_59 = arith.constant 0 : index
    %c0_60 = arith.constant 0 : index
    %93 = vector.load %arg29[%c0_57, %c0_58, %c0_59, %c0_60] : memref<1x2x16x32xf32, #tpu.memory_space<vmem>>, vector<1x1x16x32xf32>
    %94 = vector.shape_cast %93 : vector<1x1x16x32xf32> to vector<16x32xf32>
    %95 = vector.shape_cast %88 : vector<16x32xf32> to vector<1x1x16x32xf32>
    tpu.vector_store %arg29[%c0_57, %c0_58, %c0_59, %c0_60], %95 {strides = array<i32>} : memref<1x2x16x32xf32, #tpu.memory_space<vmem>>, vector<1x1x16x32xf32>,
    %c0_61 = arith.constant 0 : index
    %c0_62 = arith.constant 0 : index
    %c0_63 = arith.constant 0 : index
    %c0_64 = arith.constant 0 : index
    %96 = vector.load %arg30[%c0_61, %c0_62, %c0_63, %c0_64] : memref<1x2x16x32xf32, #tpu.memory_space<vmem>>, vector<1x1x16x32xf32>
    %97 = vector.shape_cast %96 : vector<1x1x16x32xf32> to vector<16x32xf32>
    %98 = vector.shape_cast %92 : vector<16x32xf32> to vector<1x1x16x32xf32>
    tpu.vector_store %arg30[%c0_61, %c0_62, %c0_63, %c0_64], %98 {strides = array<i32>} : memref<1x2x16x32xf32, #tpu.memory_space<vmem>>, vector<1x1x16x32xf32>,
    %99 = vector.extract_strided_slice %83 {offsets = [0, 0], sizes = [8, 32], strides = [1, 1]} : vector<16x32xf32> to vector<8x32xf32>
    %100 = vector.extract_strided_slice %99 {offsets = [0, 0], sizes = [8, 8], strides = [1, 1]} : vector<8x32xf32> to vector<8x8xf32>
    %101 = vector.extract_strided_slice %88 {offsets = [0, 0], sizes = [16, 8], strides = [1, 1]} : vector<16x32xf32> to vector<16x8xf32>
    %cst_65 = arith.constant dense<0.000000e+00> : vector<8x16xf32>
    %102 = tpu.matmul %100, %101, %cst_65 {dimension_numbers = #tpu.dot_dimension_numbers<[1], [1], [0], [0], [0, 0, 1, 0], [], []>} : vector<8x8xf32>, vector<16x8xf32>, vector<8x16xf32> -> vector<8x16xf32>
    %103 = vector.extract_strided_slice %99 {offsets = [0, 8], sizes = [8, 8], strides = [1, 1]} : vector<8x32xf32> to vector<8x8xf32>
    %104 = vector.extract_strided_slice %88 {offsets = [0, 8], sizes = [16, 8], strides = [1, 1]} : vector<16x32xf32> to vector<16x8xf32>
    %cst_66 = arith.constant dense<0.000000e+00> : vector<8x16xf32>
    %105 = tpu.matmul %103, %104, %cst_66 {dimension_numbers = #tpu.dot_dimension_numbers<[1], [1], [0], [0], [0, 0, 1, 0], [], []>} : vector<8x8xf32>, vector<16x8xf32>, vector<8x16xf32> -> vector<8x16xf32>
    %106 = vector.extract_strided_slice %99 {offsets = [0, 16], sizes = [8, 8], strides = [1, 1]} : vector<8x32xf32> to vector<8x8xf32>
    %107 = vector.extract_strided_slice %88 {offsets = [0, 16], sizes = [16, 8], strides = [1, 1]} : vector<16x32xf32> to vector<16x8xf32>
    %cst_67 = arith.constant dense<0.000000e+00> : vector<8x16xf32>
    %108 = tpu.matmul %106, %107, %cst_67 {dimension_numbers = #tpu.dot_dimension_numbers<[1], [1], [0], [0], [0, 0, 1, 0], [], []>} : vector<8x8xf32>, vector<16x8xf32>, vector<8x16xf32> -> vector<8x16xf32>
    %109 = vector.extract_strided_slice %99 {offsets = [0, 24], sizes = [8, 8], strides = [1, 1]} : vector<8x32xf32> to vector<8x8xf32>
    %110 = vector.extract_strided_slice %88 {offsets = [0, 24], sizes = [16, 8], strides = [1, 1]} : vector<16x32xf32> to vector<16x8xf32>
    %cst_68 = arith.constant dense<0.000000e+00> : vector<8x16xf32>
    %111 = tpu.matmul %109, %110, %cst_68 {dimension_numbers = #tpu.dot_dimension_numbers<[1], [1], [0], [0], [0, 0, 1, 0], [], []>} : vector<8x8xf32>, vector<16x8xf32>, vector<8x16xf32> -> vector<8x16xf32>
    %c0_69 = arith.constant 0 : index
    %c1 = arith.constant 1 : index
    %c0_70 = arith.constant 0 : index
    %c0_71 = arith.constant 0 : index
    %112 = vector.load %arg26[%c0_69, %c1, %c0_70, %c0_71] : memref<1x2x8x32xf32, #tpu.memory_space<vmem>>, vector<1x1x8x32xf32>
    %113 = vector.shape_cast %112 : vector<1x1x8x32xf32> to vector<8x32xf32>
    %114 = vector.extract_strided_slice %84 {offsets = [8, 0], sizes = [8, 32], strides = [1, 1]} : vector<16x32xf32> to vector<8x32xf32>
    %115 = tpu.concatenate %113, %114 in 0 : vector<8x32xf32>, vector<8x32xf32> -> vector<16x32xf32>
    %c0_72 = arith.constant 0 : index
    %c1_73 = arith.constant 1 : index
    %c0_74 = arith.constant 0 : index
    %c0_75 = arith.constant 0 : index
    %116 = vector.load %arg27[%c0_72, %c1_73, %c0_74, %c0_75] : memref<1x2x8x32xf32, #tpu.memory_space<vmem>>, vector<1x1x8x32xf32>
    %117 = vector.shape_cast %116 : vector<1x1x8x32xf32> to vector<8x32xf32>
    %118 = vector.extract_strided_slice %39 {offsets = [8, 0], sizes = [8, 32], strides = [1, 1]} : vector<16x32xf32> to vector<8x32xf32>
    %119 = tpu.concatenate %117, %118 in 0 : vector<8x32xf32>, vector<8x32xf32> -> vector<16x32xf32>
    %c0_76 = arith.constant 0 : index
    %c1_77 = arith.constant 1 : index
    %c0_78 = arith.constant 0 : index
    %c0_79 = arith.constant 0 : index
    %120 = vector.load %arg29[%c0_76, %c1_77, %c0_78, %c0_79] : memref<1x2x16x32xf32, #tpu.memory_space<vmem>>, vector<1x1x16x32xf32>
    %121 = vector.shape_cast %120 : vector<1x1x16x32xf32> to vector<16x32xf32>
    %122 = vector.shape_cast %115 : vector<16x32xf32> to vector<1x1x16x32xf32>
    tpu.vector_store %arg29[%c0_76, %c1_77, %c0_78, %c0_79], %122 {strides = array<i32>} : memref<1x2x16x32xf32, #tpu.memory_space<vmem>>, vector<1x1x16x32xf32>,
    %c0_80 = arith.constant 0 : index
    %c1_81 = arith.constant 1 : index
    %c0_82 = arith.constant 0 : index
    %c0_83 = arith.constant 0 : index
    %123 = vector.load %arg30[%c0_80, %c1_81, %c0_82, %c0_83] : memref<1x2x16x32xf32, #tpu.memory_space<vmem>>, vector<1x1x16x32xf32>
    %124 = vector.shape_cast %123 : vector<1x1x16x32xf32> to vector<16x32xf32>
    %125 = vector.shape_cast %119 : vector<16x32xf32> to vector<1x1x16x32xf32>
    tpu.vector_store %arg30[%c0_80, %c1_81, %c0_82, %c0_83], %125 {strides = array<i32>} : memref<1x2x16x32xf32, #tpu.memory_space<vmem>>, vector<1x1x16x32xf32>,
    %126 = vector.extract_strided_slice %83 {offsets = [8, 0], sizes = [8, 32], strides = [1, 1]} : vector<16x32xf32> to vector<8x32xf32>
    %127 = vector.extract_strided_slice %126 {offsets = [0, 0], sizes = [8, 8], strides = [1, 1]} : vector<8x32xf32> to vector<8x8xf32>
    %128 = vector.extract_strided_slice %115 {offsets = [0, 0], sizes = [16, 8], strides = [1, 1]} : vector<16x32xf32> to vector<16x8xf32>
    %cst_84 = arith.constant dense<0.000000e+00> : vector<8x16xf32>
    %129 = tpu.matmul %127, %128, %cst_84 {dimension_numbers = #tpu.dot_dimension_numbers<[1], [1], [0], [0], [0, 0, 1, 0], [], []>} : vector<8x8xf32>, vector<16x8xf32>, vector<8x16xf32> -> vector<8x16xf32>
    %130 = vector.extract_strided_slice %126 {offsets = [0, 8], sizes = [8, 8], strides = [1, 1]} : vector<8x32xf32> to vector<8x8xf32>
    %131 = vector.extract_strided_slice %115 {offsets = [0, 8], sizes = [16, 8], strides = [1, 1]} : vector<16x32xf32> to vector<16x8xf32>
    %cst_85 = arith.constant dense<0.000000e+00> : vector<8x16xf32>
    %132 = tpu.matmul %130, %131, %cst_85 {dimension_numbers = #tpu.dot_dimension_numbers<[1], [1], [0], [0], [0, 0, 1, 0], [], []>} : vector<8x8xf32>, vector<16x8xf32>, vector<8x16xf32> -> vector<8x16xf32>
    %133 = vector.extract_strided_slice %126 {offsets = [0, 16], sizes = [8, 8], strides = [1, 1]} : vector<8x32xf32> to vector<8x8xf32>
    %134 = vector.extract_strided_slice %115 {offsets = [0, 16], sizes = [16, 8], strides = [1, 1]} : vector<16x32xf32> to vector<16x8xf32>
    %cst_86 = arith.constant dense<0.000000e+00> : vector<8x16xf32>
    %135 = tpu.matmul %133, %134, %cst_86 {dimension_numbers = #tpu.dot_dimension_numbers<[1], [1], [0], [0], [0, 0, 1, 0], [], []>} : vector<8x8xf32>, vector<16x8xf32>, vector<8x16xf32> -> vector<8x16xf32>
    %136 = vector.extract_strided_slice %126 {offsets = [0, 24], sizes = [8, 8], strides = [1, 1]} : vector<8x32xf32> to vector<8x8xf32>
    %137 = vector.extract_strided_slice %115 {offsets = [0, 24], sizes = [16, 8], strides = [1, 1]} : vector<16x32xf32> to vector<16x8xf32>
    %cst_87 = arith.constant dense<0.000000e+00> : vector<8x16xf32>
    %138 = tpu.matmul %136, %137, %cst_87 {dimension_numbers = #tpu.dot_dimension_numbers<[1], [1], [0], [0], [0, 0, 1, 0], [], []>} : vector<8x8xf32>, vector<16x8xf32>, vector<8x16xf32> -> vector<8x16xf32>
    %139 = tpu.concatenate %102, %105, %108, %111, %129, %132, %135, %138 in 0 : vector<8x16xf32>, vector<8x16xf32>, vector<8x16xf32>, vector<8x16xf32>, vector<8x16xf32>, vector<8x16xf32>, vector<8x16xf32>, vector<8x16xf32> -> vector<64x16xf32>
    %c0_88 = arith.constant 0 : index
    %c0_89 = arith.constant 0 : index
    %140 = vector.load %arg2[%c0_88, %c0_89] : memref<64x16xf32, #tpu.memory_space<vmem>>, vector<64x16xf32>
    %141 = arith.addf %139, %140 : vector<64x16xf32>
    %cst_90 = arith.constant dense<0xFF800000> : vector<64xf32>
    %142 = vector.multi_reduction <maximumf>, %141, %cst_90 [1] : vector<64x16xf32> to vector<64xf32>
    %143 = vector.shape_cast %142 : vector<64xf32> to vector<64x1xf32>
    %144 = vector.broadcast %143 : vector<64x1xf32> to vector<64x16xf32>
    %145 = arith.subf %141, %144 : vector<64x16xf32>
    %146 = math.exp %145 : vector<64x16xf32>
    %cst_91 = arith.constant dense<0.000000e+00> : vector<64xf32>
    %147 = vector.multi_reduction <add>, %146, %cst_91 [1] : vector<64x16xf32> to vector<64xf32>
    %148 = vector.shape_cast %147 : vector<64xf32> to vector<64x1xf32>
    %149 = tpu.reciprocal %148 {approx = true} : vector<64x1xf32> -> vector<64x1xf32>
    %150 = vector.broadcast %149 : vector<64x1xf32> to vector<64x16xf32>
    %151 = arith.mulf %146, %150 : vector<64x16xf32>
    %152 = vector.extract_strided_slice %151 {offsets = [0, 0], sizes = [8, 16], strides = [1, 1]} : vector<64x16xf32> to vector<8x16xf32>
    %153 = vector.extract_strided_slice %92 {offsets = [0, 0], sizes = [16, 8], strides = [1, 1]} : vector<16x32xf32> to vector<16x8xf32>
    %cst_92 = arith.constant dense<0.000000e+00> : vector<8x8xf32>
    %154 = tpu.matmul %152, %153, %cst_92 {dimension_numbers = #tpu.dot_dimension_numbers<[1], [0], [0], [1], [0, 0, 1, 1], [], []>} : vector<8x16xf32>, vector<16x8xf32>, vector<8x8xf32> -> vector<8x8xf32>
    %155 = vector.extract_strided_slice %151 {offsets = [8, 0], sizes = [8, 16], strides = [1, 1]} : vector<64x16xf32> to vector<8x16xf32>
    %156 = vector.extract_strided_slice %92 {offsets = [0, 8], sizes = [16, 8], strides = [1, 1]} : vector<16x32xf32> to vector<16x8xf32>
    %cst_93 = arith.constant dense<0.000000e+00> : vector<8x8xf32>
    %157 = tpu.matmul %155, %156, %cst_93 {dimension_numbers = #tpu.dot_dimension_numbers<[1], [0], [0], [1], [0, 0, 1, 1], [], []>} : vector<8x16xf32>, vector<16x8xf32>, vector<8x8xf32> -> vector<8x8xf32>
    %158 = vector.extract_strided_slice %151 {offsets = [16, 0], sizes = [8, 16], strides = [1, 1]} : vector<64x16xf32> to vector<8x16xf32>
    %159 = vector.extract_strided_slice %92 {offsets = [0, 16], sizes = [16, 8], strides = [1, 1]} : vector<16x32xf32> to vector<16x8xf32>
    %cst_94 = arith.constant dense<0.000000e+00> : vector<8x8xf32>
    %160 = tpu.matmul %158, %159, %cst_94 {dimension_numbers = #tpu.dot_dimension_numbers<[1], [0], [0], [1], [0, 0, 1, 1], [], []>} : vector<8x16xf32>, vector<16x8xf32>, vector<8x8xf32> -> vector<8x8xf32>
    %161 = vector.extract_strided_slice %151 {offsets = [24, 0], sizes = [8, 16], strides = [1, 1]} : vector<64x16xf32> to vector<8x16xf32>
    %162 = vector.extract_strided_slice %92 {offsets = [0, 24], sizes = [16, 8], strides = [1, 1]} : vector<16x32xf32> to vector<16x8xf32>
    %cst_95 = arith.constant dense<0.000000e+00> : vector<8x8xf32>
    %163 = tpu.matmul %161, %162, %cst_95 {dimension_numbers = #tpu.dot_dimension_numbers<[1], [0], [0], [1], [0, 0, 1, 1], [], []>} : vector<8x16xf32>, vector<16x8xf32>, vector<8x8xf32> -> vector<8x8xf32>
    %164 = tpu.concatenate %154, %157, %160, %163 in 1 : vector<8x8xf32>, vector<8x8xf32>, vector<8x8xf32>, vector<8x8xf32> -> vector<8x32xf32>
    %165 = vector.extract_strided_slice %151 {offsets = [32, 0], sizes = [8, 16], strides = [1, 1]} : vector<64x16xf32> to vector<8x16xf32>
    %166 = vector.extract_strided_slice %119 {offsets = [0, 0], sizes = [16, 8], strides = [1, 1]} : vector<16x32xf32> to vector<16x8xf32>
    %cst_96 = arith.constant dense<0.000000e+00> : vector<8x8xf32>
    %167 = tpu.matmul %165, %166, %cst_96 {dimension_numbers = #tpu.dot_dimension_numbers<[1], [0], [0], [1], [0, 0, 1, 1], [], []>} : vector<8x16xf32>, vector<16x8xf32>, vector<8x8xf32> -> vector<8x8xf32>
    %168 = vector.extract_strided_slice %151 {offsets = [40, 0], sizes = [8, 16], strides = [1, 1]} : vector<64x16xf32> to vector<8x16xf32>
    %169 = vector.extract_strided_slice %119 {offsets = [0, 8], sizes = [16, 8], strides = [1, 1]} : vector<16x32xf32> to vector<16x8xf32>
    %cst_97 = arith.constant dense<0.000000e+00> : vector<8x8xf32>
    %170 = tpu.matmul %168, %169, %cst_97 {dimension_numbers = #tpu.dot_dimension_numbers<[1], [0], [0], [1], [0, 0, 1, 1], [], []>} : vector<8x16xf32>, vector<16x8xf32>, vector<8x8xf32> -> vector<8x8xf32>
    %171 = vector.extract_strided_slice %151 {offsets = [48, 0], sizes = [8, 16], strides = [1, 1]} : vector<64x16xf32> to vector<8x16xf32>
    %172 = vector.extract_strided_slice %119 {offsets = [0, 16], sizes = [16, 8], strides = [1, 1]} : vector<16x32xf32> to vector<16x8xf32>
    %cst_98 = arith.constant dense<0.000000e+00> : vector<8x8xf32>
    %173 = tpu.matmul %171, %172, %cst_98 {dimension_numbers = #tpu.dot_dimension_numbers<[1], [0], [0], [1], [0, 0, 1, 1], [], []>} : vector<8x16xf32>, vector<16x8xf32>, vector<8x8xf32> -> vector<8x8xf32>
    %174 = vector.extract_strided_slice %151 {offsets = [56, 0], sizes = [8, 16], strides = [1, 1]} : vector<64x16xf32> to vector<8x16xf32>
    %175 = vector.extract_strided_slice %119 {offsets = [0, 24], sizes = [16, 8], strides = [1, 1]} : vector<16x32xf32> to vector<16x8xf32>
    %cst_99 = arith.constant dense<0.000000e+00> : vector<8x8xf32>
    %176 = tpu.matmul %174, %175, %cst_99 {dimension_numbers = #tpu.dot_dimension_numbers<[1], [0], [0], [1], [0, 0, 1, 1], [], []>} : vector<8x16xf32>, vector<16x8xf32>, vector<8x8xf32> -> vector<8x8xf32>
    %177 = tpu.concatenate %167, %170, %173, %176 in 1 : vector<8x8xf32>, vector<8x8xf32>, vector<8x8xf32>, vector<8x8xf32> -> vector<8x32xf32>
    %178 = tpu.concatenate %164, %177 in 0 : vector<8x32xf32>, vector<8x32xf32> -> vector<16x32xf32>
    %c0_100 = arith.constant 0 : index
    %c0_101 = arith.constant 0 : index
    %c0_102 = arith.constant 0 : index
    %179 = vector.load %arg18[%c0_100, %c0_101, %c0_102] : memref<1x32x32xf32, #tpu.memory_space<vmem>>, vector<1x32x32xf32>
    %180 = vector.shape_cast %179 : vector<1x32x32xf32> to vector<32x32xf32>
    %cst_103 = arith.constant dense<0.000000e+00> : vector<16x32xf32>
    %181 = tpu.matmul %178, %180, %cst_103 {dimension_numbers = #tpu.dot_dimension_numbers<[1], [0], [0], [1], [0, 0, 1, 1], [], []>} : vector<16x32xf32>, vector<32x32xf32>, vector<16x32xf32> -> vector<16x32xf32>
    %c0_104 = arith.constant 0 : index
    %c0_105 = arith.constant 0 : index
    %c0_106 = arith.constant 0 : index
    %182 = vector.load %arg19[%c0_104, %c0_105, %c0_106] : memref<1x1x32xf32, #tpu.memory_space<vmem>>, vector<1x1x32xf32>
    %183 = vector.shape_cast %182 : vector<1x1x32xf32> to vector<1x32xf32>
    %184 = vector.broadcast %183 : vector<1x32xf32> to vector<16x32xf32>
    %185 = arith.addf %181, %184 : vector<16x32xf32>
    %186 = arith.addf %3, %185 : vector<16x32xf32>
    %c0_107 = arith.constant 0 : index
    %c0_108 = arith.constant 0 : index
    %c0_109 = arith.constant 0 : index
    %187 = vector.load %arg20[%c0_107, %c0_108, %c0_109] : memref<1x1x32xf32, #tpu.memory_space<vmem>>, vector<1x1x32xf32>
    %188 = vector.shape_cast %187 : vector<1x1x32xf32> to vector<1x32xf32>
    %c0_110 = arith.constant 0 : index
    %c0_111 = arith.constant 0 : index
    %c0_112 = arith.constant 0 : index
    %189 = vector.load %arg21[%c0_110, %c0_111, %c0_112] : memref<1x1x32xf32, #tpu.memory_space<vmem>>, vector<1x1x32xf32>
    %190 = vector.shape_cast %189 : vector<1x1x32xf32> to vector<1x32xf32>
    %cst_113 = arith.constant dense<0.000000e+00> : vector<16xf32>
    %191 = vector.multi_reduction <add>, %186, %cst_113 [1] : vector<16x32xf32> to vector<16xf32>
    %192 = vector.shape_cast %191 : vector<16xf32> to vector<16x1xf32>
    %cst_114 = arith.constant 3.200000e+01 : f32
    %193 = vector.broadcast %cst_114 : f32 to vector<16x1xf32>
    %194 = arith.divf %192, %193 : vector<16x1xf32>
    %195 = vector.broadcast %194 : vector<16x1xf32> to vector<16x32xf32>
    %196 = arith.subf %186, %195 : vector<16x32xf32>
    %197 = arith.mulf %196, %196 : vector<16x32xf32>
    %cst_115 = arith.constant dense<0.000000e+00> : vector<16xf32>
    %198 = vector.multi_reduction <add>, %197, %cst_115 [1] : vector<16x32xf32> to vector<16xf32>
    %199 = vector.shape_cast %198 : vector<16xf32> to vector<16x1xf32>
    %cst_116 = arith.constant 3.200000e+01 : f32
    %200 = vector.broadcast %cst_116 : f32 to vector<16x1xf32>
    %201 = arith.divf %199, %200 : vector<16x1xf32>
    %202 = vector.broadcast %194 : vector<16x1xf32> to vector<16x32xf32>
    %203 = arith.subf %186, %202 : vector<16x32xf32>
    %cst_117 = arith.constant 9.99999974E-6 : f32
    %204 = vector.broadcast %cst_117 : f32 to vector<16x1xf32>
    %205 = arith.addf %201, %204 : vector<16x1xf32>
    %206 = math.rsqrt %205 : vector<16x1xf32>
    %207 = vector.broadcast %206 : vector<16x1xf32> to vector<16x32xf32>
    %208 = arith.mulf %203, %207 : vector<16x32xf32>
    %209 = vector.broadcast %188 : vector<1x32xf32> to vector<16x32xf32>
    %210 = arith.mulf %208, %209 : vector<16x32xf32>
    %211 = vector.broadcast %190 : vector<1x32xf32> to vector<16x32xf32>
    %212 = arith.addf %210, %211 : vector<16x32xf32>
    %c0_118 = arith.constant 0 : index
    %c0_119 = arith.constant 0 : index
    %c0_120 = arith.constant 0 : index
    %213 = vector.load %arg22[%c0_118, %c0_119, %c0_120] : memref<1x32x128xf32, #tpu.memory_space<vmem>>, vector<1x32x128xf32>
    %214 = vector.shape_cast %213 : vector<1x32x128xf32> to vector<32x128xf32>
    %cst_121 = arith.constant dense<0.000000e+00> : vector<16x128xf32>
    %215 = tpu.matmul %212, %214, %cst_121 {dimension_numbers = #tpu.dot_dimension_numbers<[1], [0], [0], [1], [0, 0, 1, 1], [], []>} : vector<16x32xf32>, vector<32x128xf32>, vector<16x128xf32> -> vector<16x128xf32>
    %c0_122 = arith.constant 0 : index
    %c0_123 = arith.constant 0 : index
    %c0_124 = arith.constant 0 : index
    %216 = vector.load %arg23[%c0_122, %c0_123, %c0_124] : memref<1x1x128xf32, #tpu.memory_space<vmem>>, vector<1x1x128xf32>
    %217 = vector.shape_cast %216 : vector<1x1x128xf32> to vector<1x128xf32>
    %218 = vector.broadcast %217 : vector<1x128xf32> to vector<16x128xf32>
    %219 = arith.addf %215, %218 : vector<16x128xf32>
    %cst_125 = arith.constant 0.000000e+00 : f32
    %220 = vector.broadcast %cst_125 : f32 to vector<16x128xf32>
    %221 = arith.maximumf %219, %220 : vector<16x128xf32>
    %222 = arith.mulf %221, %221 : vector<16x128xf32>
    %c0_126 = arith.constant 0 : index
    %c0_127 = arith.constant 0 : index
    %c0_128 = arith.constant 0 : index
    %223 = vector.load %arg24[%c0_126, %c0_127, %c0_128] : memref<1x128x32xf32, #tpu.memory_space<vmem>>, vector<1x128x32xf32>
    %224 = vector.shape_cast %223 : vector<1x128x32xf32> to vector<128x32xf32>
    %cst_129 = arith.constant dense<0.000000e+00> : vector<16x32xf32>
    %225 = tpu.matmul %222, %224, %cst_129 {dimension_numbers = #tpu.dot_dimension_numbers<[1], [0], [0], [1], [0, 0, 1, 1], [], []>} : vector<16x128xf32>, vector<128x32xf32>, vector<16x32xf32> -> vector<16x32xf32>
    %c0_130 = arith.constant 0 : index
    %c0_131 = arith.constant 0 : index
    %c0_132 = arith.constant 0 : index
    %226 = vector.load %arg25[%c0_130, %c0_131, %c0_132] : memref<1x1x32xf32, #tpu.memory_space<vmem>>, vector<1x1x32xf32>
    %227 = vector.shape_cast %226 : vector<1x1x32xf32> to vector<1x32xf32>
    %228 = vector.broadcast %227 : vector<1x32xf32> to vector<16x32xf32>
    %229 = arith.addf %225, %228 : vector<16x32xf32>
    %230 = arith.addf %186, %229 : vector<16x32xf32>
    %c0_133 = arith.constant 0 : index
    %c0_134 = arith.constant 0 : index
    %231 = vector.load %arg31[%c0_133, %c0_134] : memref<16x32xf32, #tpu.memory_space<vmem>>, vector<16x32xf32>
    tpu.vector_store %arg31[%c0_133, %c0_134], %230 {strides = array<i32>} : memref<16x32xf32, #tpu.memory_space<vmem>>, vector<16x32xf32>,
    %c1_i32 = arith.constant 1 : i32
    %232 = arith.cmpi eq, %arg0, %c1_i32 : i32
    %233 = arith.extui %232 : i1 to i32
    %c0_i32_135 = arith.constant 0 : i32
    %234 = arith.cmpi ne, %233, %c0_i32_135 : i32
    scf.if %234 {
      %c0_136 = arith.constant 0 : index
      %c0_137 = arith.constant 0 : index
      %235 = vector.load %arg8[%c0_136, %c0_137] : memref<1x32xf32, #tpu.memory_space<vmem>>, vector<1x32xf32>
      %c0_138 = arith.constant 0 : index
      %c0_139 = arith.constant 0 : index
      %236 = vector.load %arg9[%c0_138, %c0_139] : memref<1x32xf32, #tpu.memory_space<vmem>>, vector<1x32xf32>
      %cst_140 = arith.constant dense<0.000000e+00> : vector<16xf32>
      %237 = vector.multi_reduction <add>, %230, %cst_140 [1] : vector<16x32xf32> to vector<16xf32>
      %238 = vector.shape_cast %237 : vector<16xf32> to vector<16x1xf32>
      %cst_141 = arith.constant 3.200000e+01 : f32
      %239 = vector.broadcast %cst_141 : f32 to vector<16x1xf32>
      %240 = arith.divf %238, %239 : vector<16x1xf32>
      %241 = vector.broadcast %240 : vector<16x1xf32> to vector<16x32xf32>
      %242 = arith.subf %230, %241 : vector<16x32xf32>
      %243 = arith.mulf %242, %242 : vector<16x32xf32>
      %cst_142 = arith.constant dense<0.000000e+00> : vector<16xf32>
      %244 = vector.multi_reduction <add>, %243, %cst_142 [1] : vector<16x32xf32> to vector<16xf32>
      %245 = vector.shape_cast %244 : vector<16xf32> to vector<16x1xf32>
      %cst_143 = arith.constant 3.200000e+01 : f32
      %246 = vector.broadcast %cst_143 : f32 to vector<16x1xf32>
      %247 = arith.divf %245, %246 : vector<16x1xf32>
      %248 = vector.broadcast %240 : vector<16x1xf32> to vector<16x32xf32>
      %249 = arith.subf %230, %248 : vector<16x32xf32>
      %cst_144 = arith.constant 9.99999974E-6 : f32
      %250 = vector.broadcast %cst_144 : f32 to vector<16x1xf32>
      %251 = arith.addf %247, %250 : vector<16x1xf32>
      %252 = math.rsqrt %251 : vector<16x1xf32>
      %253 = vector.broadcast %252 : vector<16x1xf32> to vector<16x32xf32>
      %254 = arith.mulf %249, %253 : vector<16x32xf32>
      %255 = vector.broadcast %235 : vector<1x32xf32> to vector<16x32xf32>
      %256 = arith.mulf %254, %255 : vector<16x32xf32>
      %257 = vector.broadcast %236 : vector<1x32xf32> to vector<16x32xf32>
      %258 = arith.addf %256, %257 : vector<16x32xf32>
      %c0_145 = arith.constant 0 : index
      %c0_146 = arith.constant 0 : index
      %259 = vector.load %arg28[%c0_145, %c0_146] : memref<16x32xf32, #tpu.memory_space<vmem>>, vector<16x32xf32>
      tpu.vector_store %arg28[%c0_145, %c0_146], %258 {strides = array<i32>} : memref<16x32xf32, #tpu.memory_space<vmem>>, vector<16x32xf32>,
    } else {
    }
    return
  }
  func.func @transform_0(%arg0: i32) -> (i32, i32) {
    %c0_i32 = arith.constant 0 : i32
    %c0_i32_0 = arith.constant 0 : i32
    %c0_i32_1 = arith.constant 0 : i32
    return %c0_i32, %c0_i32_0 : i32, i32
  }
  func.func @transform_1(%arg0: i32) -> (i32, i32) {
    %c0_i32 = arith.constant 0 : i32
    %c0_i32_0 = arith.constant 0 : i32
    %c0_i32_1 = arith.constant 0 : i32
    return %c0_i32, %c0_i32_0 : i32, i32
  }
  func.func @transform_2(%arg0: i32) -> (i32, i32) {
    %c0_i32 = arith.constant 0 : i32
    %c0_i32_0 = arith.constant 0 : i32
    %c0_i32_1 = arith.constant 0 : i32
    return %c0_i32, %c0_i32_0 : i32, i32
  }
  func.func @transform_3(%arg0: i32) -> (i32, i32) {
    %c0_i32 = arith.constant 0 : i32
    %c0_i32_0 = arith.constant 0 : i32
    %c0_i32_1 = arith.constant 0 : i32
    return %c0_i32, %c0_i32_0 : i32, i32
  }
  func.func @transform_4(%arg0: i32) -> (i32, i32) {
    %c0_i32 = arith.constant 0 : i32
    %c0_i32_0 = arith.constant 0 : i32
    %c0_i32_1 = arith.constant 0 : i32
    return %c0_i32, %c0_i32_0 : i32, i32
  }
  func.func @transform_5(%arg0: i32) -> (i32, i32) {
    %c0_i32 = arith.constant 0 : i32
    %c0_i32_0 = arith.constant 0 : i32
    %c0_i32_1 = arith.constant 0 : i32
    return %c0_i32, %c0_i32_0 : i32, i32
  }
  func.func @transform_6(%arg0: i32) -> (i32, i32) {
    %c0_i32 = arith.constant 0 : i32
    %c0_i32_0 = arith.constant 0 : i32
    %c0_i32_1 = arith.constant 0 : i32
    return %c0_i32, %c0_i32_0 : i32, i32
  }
  func.func @transform_7(%arg0: i32) -> (i32, i32) {
    %c0_i32 = arith.constant 0 : i32
    %c0_i32_0 = arith.constant 0 : i32
    %c0_i32_1 = arith.constant 0 : i32
    return %c0_i32, %c0_i32_0 : i32, i32
  }
  func.func @transform_8(%arg0: i32) -> (i32, i32) {
    %c0_i32 = arith.constant 0 : i32
    %c0_i32_0 = arith.constant 0 : i32
    %c0_i32_1 = arith.constant 0 : i32
    return %c0_i32, %c0_i32_0 : i32, i32
  }
  func.func @transform_9(%arg0: i32) -> (i32, i32, i32) {
    %c0_i32 = arith.constant 0 : i32
    %c0_i32_0 = arith.constant 0 : i32
    %c0_i32_1 = arith.constant 0 : i32
    return %arg0, %c0_i32, %c0_i32_0 : i32, i32, i32
  }
  func.func @transform_10(%arg0: i32) -> (i32, i32, i32) {
    %c0_i32 = arith.constant 0 : i32
    %c0_i32_0 = arith.constant 0 : i32
    %c0_i32_1 = arith.constant 0 : i32
    return %arg0, %c0_i32, %c0_i32_0 : i32, i32, i32
  }
  func.func @transform_11(%arg0: i32) -> (i32, i32, i32) {
    %c0_i32 = arith.constant 0 : i32
    %c0_i32_0 = arith.constant 0 : i32
    %c0_i32_1 = arith.constant 0 : i32
    return %arg0, %c0_i32, %c0_i32_0 : i32, i32, i32
  }
  func.func @transform_12(%arg0: i32) -> (i32, i32, i32) {
    %c0_i32 = arith.constant 0 : i32
    %c0_i32_0 = arith.constant 0 : i32
    %c0_i32_1 = arith.constant 0 : i32
    return %arg0, %c0_i32, %c0_i32_0 : i32, i32, i32
  }
  func.func @transform_13(%arg0: i32) -> (i32, i32, i32) {
    %c0_i32 = arith.constant 0 : i32
    %c0_i32_0 = arith.constant 0 : i32
    %c0_i32_1 = arith.constant 0 : i32
    return %arg0, %c0_i32, %c0_i32_0 : i32, i32, i32
  }
  func.func @transform_14(%arg0: i32) -> (i32, i32, i32) {
    %c0_i32 = arith.constant 0 : i32
    %c0_i32_0 = arith.constant 0 : i32
    %c0_i32_1 = arith.constant 0 : i32
    return %arg0, %c0_i32, %c0_i32_0 : i32, i32, i32
  }
  func.func @transform_15(%arg0: i32) -> (i32, i32, i32) {
    %c0_i32 = arith.constant 0 : i32
    %c0_i32_0 = arith.constant 0 : i32
    %c0_i32_1 = arith.constant 0 : i32
    return %arg0, %c0_i32, %c0_i32_0 : i32, i32, i32
  }
  func.func @transform_16(%arg0: i32) -> (i32, i32, i32) {
    %c0_i32 = arith.constant 0 : i32
    %c0_i32_0 = arith.constant 0 : i32
    %c0_i32_1 = arith.constant 0 : i32
    return %arg0, %c0_i32, %c0_i32_0 : i32, i32, i32
  }
  func.func @transform_17(%arg0: i32) -> (i32, i32, i32) {
    %c0_i32 = arith.constant 0 : i32
    %c0_i32_0 = arith.constant 0 : i32
    %c0_i32_1 = arith.constant 0 : i32
    return %arg0, %c0_i32, %c0_i32_0 : i32, i32, i32
  }
  func.func @transform_18(%arg0: i32) -> (i32, i32, i32) {
    %c0_i32 = arith.constant 0 : i32
    %c0_i32_0 = arith.constant 0 : i32
    %c0_i32_1 = arith.constant 0 : i32
    return %arg0, %c0_i32, %c0_i32_0 : i32, i32, i32
  }
  func.func @transform_19(%arg0: i32) -> (i32, i32, i32) {
    %c0_i32 = arith.constant 0 : i32
    %c0_i32_0 = arith.constant 0 : i32
    %c0_i32_1 = arith.constant 0 : i32
    return %arg0, %c0_i32, %c0_i32_0 : i32, i32, i32
  }
  func.func @transform_20(%arg0: i32) -> (i32, i32, i32) {
    %c0_i32 = arith.constant 0 : i32
    %c0_i32_0 = arith.constant 0 : i32
    %c0_i32_1 = arith.constant 0 : i32
    return %arg0, %c0_i32, %c0_i32_0 : i32, i32, i32
  }
  func.func @transform_21(%arg0: i32) -> (i32, i32, i32) {
    %c0_i32 = arith.constant 0 : i32
    %c0_i32_0 = arith.constant 0 : i32
    %c0_i32_1 = arith.constant 0 : i32
    return %arg0, %c0_i32, %c0_i32_0 : i32, i32, i32
  }
  func.func @transform_22(%arg0: i32) -> (i32, i32, i32) {
    %c0_i32 = arith.constant 0 : i32
    %c0_i32_0 = arith.constant 0 : i32
    %c0_i32_1 = arith.constant 0 : i32
    return %arg0, %c0_i32, %c0_i32_0 : i32, i32, i32
  }
  func.func @transform_23(%arg0: i32) -> (i32, i32, i32) {
    %c0_i32 = arith.constant 0 : i32
    %c0_i32_0 = arith.constant 0 : i32
    %c0_i32_1 = arith.constant 0 : i32
    return %arg0, %c0_i32, %c0_i32_0 : i32, i32, i32
  }
  func.func @transform_24(%arg0: i32) -> (i32, i32, i32) {
    %c0_i32 = arith.constant 0 : i32
    %c0_i32_0 = arith.constant 0 : i32
    %c0_i32_1 = arith.constant 0 : i32
    return %arg0, %c0_i32, %c0_i32_0 : i32, i32, i32
  }
  func.func @transform_25(%arg0: i32) -> (i32, i32, i32, i32) {
    %c0_i32 = arith.constant 0 : i32
    %c0_i32_0 = arith.constant 0 : i32
    %c0_i32_1 = arith.constant 0 : i32
    %c0_i32_2 = arith.constant 0 : i32
    return %arg0, %c0_i32, %c0_i32_0, %c0_i32_1 : i32, i32, i32, i32
  }
  func.func @transform_26(%arg0: i32) -> (i32, i32, i32, i32) {
    %c0_i32 = arith.constant 0 : i32
    %c0_i32_0 = arith.constant 0 : i32
    %c0_i32_1 = arith.constant 0 : i32
    %c0_i32_2 = arith.constant 0 : i32
    return %arg0, %c0_i32, %c0_i32_0, %c0_i32_1 : i32, i32, i32, i32
  }
  func.func @transform_27(%arg0: i32) -> (i32, i32) {
    %c0_i32 = arith.constant 0 : i32
    %c0_i32_0 = arith.constant 0 : i32
    %c0_i32_1 = arith.constant 0 : i32
    return %c0_i32, %c0_i32_0 : i32, i32
  }
  func.func @transform_28(%arg0: i32) -> (i32, i32, i32, i32) {
    %c0_i32 = arith.constant 0 : i32
    %c0_i32_0 = arith.constant 0 : i32
    %c0_i32_1 = arith.constant 0 : i32
    %c0_i32_2 = arith.constant 0 : i32
    return %arg0, %c0_i32, %c0_i32_0, %c0_i32_1 : i32, i32, i32, i32
  }
  func.func @transform_29(%arg0: i32) -> (i32, i32, i32, i32) {
    %c0_i32 = arith.constant 0 : i32
    %c0_i32_0 = arith.constant 0 : i32
    %c0_i32_1 = arith.constant 0 : i32
    %c0_i32_2 = arith.constant 0 : i32
    return %arg0, %c0_i32, %c0_i32_0, %c0_i32_1 : i32, i32, i32, i32
  }
}

</mosaic_0001>

<bundles_post_ra>
// kernel: tile.137
= control target key start
LH: loop header
LB: loop body
LE: loop exit
PB: predicated region body
PF: predicated region fallthrough
CT: control target
= control target key end

     0   :  { %s22_s0 = inlined_call_operand.vmem [shape: f32[8], index: 0, kind: input, shape index: {}]   ;;  %s23_s1 = inlined_call_operand.vmem [shape: f32[4,8], index: 1, kind: output, shape index: {}]  }
   0x1   :  { %v4_v0 = vld [vmem:[%s22_s0] ss:$0 sm:$0xff] }
   0x2   :  { %5 = vst [vmem:[%s23_s1] sm:$0xf] %v4_v0 }

// kernel: tile.142
= control target key start
LH: loop header
LB: loop body
LE: loop exit
PB: predicated region body
PF: predicated region fallthrough
CT: control target
= control target key end

     0   :  { %vm8_vm0 = vcmask 64512   ;;  %s40_s8 = smov 8   ;;  %s41_s9 = smov 16   ;;  %vm14_vm1 = vcmask 261312   ;;  %vm20_vm2 = vcmask 195712   ;;  %vm26_vm3 = vcmask 130112   ;;  %s58_s0 = inlined_call_operand.vmem [shape: f32[4,8], index: 0, kind: input, shape index: {}]   ;;  %s59_s1 = inlined_call_operand.vmem [shape: f32[1,1,32], index: 1, kind: output, shape index: {}]  }
   0x1   :  { %v5_v0 = vld [vmem:[%s58_s0] sm:$0xf]  ;;  %s39_s0 = smov 24  }
   0x2   :  { %6 = vst [vmem:[#allocation1] sm:$0xf] %v5_v0 }
   0x9   :  { %v11_v1 = vld [vmem:[#allocation1 + $0x3] sm:$0x1]   ;;  %v23_v2 = vld [vmem:[#allocation1 + $0x1] sm:$0x1]   ;;  %v7_v3 = vld [vmem:[#allocation1] sm:$0x1]  }
   0xa   :  { %12 = vrot.lane.b32.xlu0 %v11_v1, %s39_s0  ;;  %24 = vrot.lane.b32.xlu1 %v23_v2, %s40_s8  ;;  %v17_v4 = vld [vmem:[#allocation1 + $0x2] sm:$0x1]   ;;  %9 = vst.msk [vmem:[#allocation0] sm:$0x1] %vm8_vm0, %v7_v3  }
   0xe   :  { %18 = vrot.lane.b32.xlu0 %v17_v4, %s41_s9 }
  0x7c   :  { %v13_v5 = vpop.permute.xlu0 %12   ;;  %v25_v6 = vpop.permute.xlu1 %24  }
  0x7d   :  { %15 = vst.msk [vmem:[#allocation0] sm:$0x1] %vm14_vm1, %v13_v5  }
  0x80   :  { %v19_v7 = vpop.permute.xlu0 %18  }
  0x81   :  { %21 = vst.msk [vmem:[#allocation0] sm:$0x1] %vm20_vm2, %v19_v7  }
  0x82   :  { %27 = vst.msk [vmem:[#allocation0] sm:$0x1] %vm26_vm3, %v25_v6  }
  0x89   :  { %v32_v8 = vld [vmem:[#allocation0] sm:$0x1] }
  0x8a   :  { %35 = vst [vmem:[%s59_s1] sm:$0x1] %v32_v8 }

// kernel: fuyu_txt_decoder_forward.1
= control target key start
LH: loop header
LB: loop body
LE: loop exit
PB: predicated region body
PF: predicated region fallthrough
CT: control target
= control target key end

     0   :  { %s4658_s6 = smov 1   ;;  %s4659_s10 = smov 2   ;;  %s5351_s0 = inlined_call_operand.smem [shape: u32[30], index: -1, kind: input, shape index: {}] }
   0x1   :  { %s4707_s5 = sld [smem:[%s5351_s0]]   ;;  %s4660_s14 = smov 3  }
   0x2   :  { %s4712_s9 = sld [smem:[%s5351_s0 + %s4658_s6]]   ;;  %s4661_s18 = smov 4  }
   0x3   :  { %s4717_s13 = sld [smem:[%s5351_s0 + %s4659_s10]]   ;;  %s4662_s22 = smov 5  }
   0x4   :  { %s4722_s17 = sld [smem:[%s5351_s0 + %s4660_s14]]   ;;  %s4663_s26 = smov 6  }
   0x5   :  { %s4727_s21 = sld [smem:[%s5351_s0 + %s4661_s18]]   ;;  %s4664_s30 = smov 7  }
   0x6   :  { %s4732_s25 = sld [smem:[%s5351_s0 + %s4662_s22]]   ;;  %s4665_s4 = smov 8  }
   0x7   :  { %5362 = sst [smem:[#allocation6_spill]] %s4707_s5  ;;  %s4666_s10 = smov 9  }
   0x8   :  { %5363 = sst [smem:[#allocation7_spill]] %s4712_s9  ;;  %s4667_s15 = smov 10  }
   0x9   :  { %5364 = sst [smem:[#allocation8_spill]] %s4717_s13  ;;  %s4668_s20 = smov 11  }
   0xa   :  { %5365 = sst [smem:[#allocation9_spill]] %s4722_s17  ;;  %s4670_s1 = smov 13  }
   0xb   :  { %5366 = sst [smem:[#allocation10_spill]] %s4727_s21  ;;  %s4671_s7 = smov 14  }
   0xc   :  { %5367 = sst [smem:[#allocation11_spill]] %s4732_s25  ;;  %s4673_s22 = smov 16  }
   0xd   :  { %s4737_s29 = sld [smem:[%s5351_s0 + %s4663_s26]]   ;;  %s4669_s26 = smov 12  }
   0xe   :  { %s4742_s3 = sld [smem:[%s5351_s0 + %s4664_s30]]   ;;  %s4674_s28 = smov 17  }
   0xf   :  { %s4747_s8 = sld [smem:[%s5351_s0 + %s4665_s4]]  }
  0x10   :  { %s4752_s14 = sld [smem:[%s5351_s0 + %s4666_s10]]  }
  0x11   :  { %s4757_s19 = sld [smem:[%s5351_s0 + %s4667_s15]]   ;;  %s4672_s15 = smov 15  }
  0x12   :  { %s4762_s24 = sld [smem:[%s5351_s0 + %s4668_s20]]  }
  0x13   :  { %5368 = sst [smem:[#allocation12_spill]] %s4737_s29 }
  0x14   :  { %5369 = sst [smem:[#allocation13_spill]] %s4742_s3 }
  0x15   :  { %5370 = sst [smem:[#allocation14_spill]] %s4747_s8 }
  0x16   :  { %5371 = sst [smem:[#allocation15_spill]] %s4752_s14 }
  0x17   :  { %5372 = sst [smem:[#allocation16_spill]] %s4757_s19 }
  0x18   :  { %5373 = sst [smem:[#allocation17_spill]] %s4762_s24 }
  0x19   :  { %s4767_s30 = sld [smem:[%s5351_s0 + %s4669_s26]]  }
  0x1a   :  { %s4772_s6 = sld [smem:[%s5351_s0 + %s4670_s1]]  }
  0x1b   :  { %s4777_s12 = sld [smem:[%s5351_s0 + %s4671_s7]]   ;;  %s4675_s7 = smov 18  }
  0x1c   :  { %s4782_s20 = sld [smem:[%s5351_s0 + %s4672_s15]]   ;;  %s4676_s15 = smov 19  }
  0x1d   :  { %s4787_s27 = sld [smem:[%s5351_s0 + %s4673_s22]]   ;;  %s4677_s22 = smov 20  }
  0x1e   :  { %s4792_s4 = sld [smem:[%s5351_s0 + %s4674_s28]]   ;;  %s4678_s28 = smov 21  }
  0x1f   :  { %5374 = sst [smem:[#allocation18_spill]] %s4767_s30 }
  0x20   :  { %5375 = sst [smem:[#allocation19_spill]] %s4772_s6 }
  0x21   :  { %5376 = sst [smem:[#allocation20_spill]] %s4777_s12 }
  0x22   :  { %s4797_s8 = sld [smem:[%s5351_s0 + %s4675_s7]]   ;;  %s4679_s7 = smov 22  }
  0x23   :  { %s4802_s3 = sld [smem:[%s5351_s0 + %s4676_s15]]   ;;  %s4680_s15 = smov 23  }
  0x24   :  { %s4807_s9 = sld [smem:[%s5351_s0 + %s4677_s22]]   ;;  %s4681_s22 = smov 24  }
  0x25   :  { %s4812_s17 = sld [smem:[%s5351_s0 + %s4678_s28]]   ;;  %s4682_s28 = smov 25  }
  0x26   :  { %s4817_s13 = sld [smem:[%s5351_s0 + %s4679_s7]]   ;;  %s4683_s7 = smov 26  }
  0x27   :  { %s4822_s21 = sld [smem:[%s5351_s0 + %s4680_s15]]   ;;  %s4684_s15 = smov 27  }
  0x28   :  { %s4827_s29 = sld [smem:[%s5351_s0 + %s4681_s22]]   ;;  %s4685_s22 = smov 28  }
  0x29   :  { %s4832_s25 = sld [smem:[%s5351_s0 + %s4682_s28]]   ;;  %s4686_s28 = smov 29  }
  0x2a   :  { %s4837_s5 = sld [smem:[%s5351_s0 + %s4683_s7]]  }
  0x2d   :  { %5377 = sst [smem:[#allocation21_spill]] %s4822_s21 }
  0x2e   :  { %5378 = sst [smem:[#allocation22_spill]] %s4827_s29 }
  0x2f   :  { %5379 = sst [smem:[#allocation23_spill]] %s4832_s25 }
  0x30   :  { %s4842_s21 = sld [smem:[%s5351_s0 + %s4684_s15]]  }
  0x31   :  { %s4847_s29 = sld [smem:[%s5351_s0 + %s4685_s22]]  }
  0x32   :  { %s4852_s25 = sld [smem:[%s5351_s0 + %s4686_s28]]  }
  0x36   :  { %5380 = sst [smem:[#allocation24_spill]] %s4842_s21 }
  0x37   :  { %65 = vsyncpa [#allocation4], 0  ;;  %s4854_s7 = smov 0  }
  0x38 LB: > { %5381 = sst [smem:[#allocation25_spill]] %s4656_s7  ;;  %s4860_s10 = sadd.s32 4294967295, %s4656_s7   ;;  %s4656_s7 = sphi %s4854_s7, %s71_s7  }
  0x39   : > { %5382 = sst [smem:[#allocation26_spill]] %s4860_s10  ;;  %p4046_p0 = scmp.ge.s32.totalorder %s4656_s7, 1 }
  0x3a   : > { %p964_p1 = scmp.lt.s32.totalorder %s4656_s7, 3 }
  0x3c   : > { %p965_p2 = pnand %p4046_p0, %p964_p1 }
  0x3e   : > { %968 = sbr.rel (%p965_p2) target bundleno = 4009 (0xfa9), region = 128 }
  0x43   : > { %s5386_s24 = sld [smem:[#allocation17_spill]]  ;;  %p1106_p3 = scmp.lt.s32.totalorder %s4860_s10, 1 }
  0x44   : > { %s5389_s15 = sld [smem:[#allocation21_spill]] }
  0x45   : > { %s4866_s0 = scalar_select %p1106_p3, %s4860_s10, 1 }
  0x46   : > { %s5390_s18 = sld [smem:[#allocation22_spill]] }
  0x47   : > { %s4149_s22 = sshll.u32 %s4866_s0, 5  ;;  %s5392_s28 = sld [smem:[#allocation23_spill]] }
  0x48   : > { %s4887_s10 = scalar_lea.vmem %s4792_s4, %s4149_s22  ;;  %s1139_s11 = scalar_lea.vmem %s4797_s8, %s4866_s0 }
  0x49   : > { %s4876_s26 = scalar_lea.vmem %s5386_s24, %s4149_s22  ;;  %s1142_s14 = scalar_lea.vmem %s4802_s3, %s4866_s0 }
  0x4a   : > { %5391 = sst [smem:[#allocation27_spill]] %s4876_s26  ;;  %s4896_s19 = scalar_lea.vmem %s4812_s17, %s4149_s22 }
  0x4b   : > { %s1153_s23 = scalar_lea.vmem %s4817_s13, %s4866_s0  ;;  %s4152_s30 = sshll.u32 %s4866_s0, 7 }
  0x4c   : > { %s4902_s24 = scalar_lea.vmem %s5389_s15, %s4152_s30  ;;  %s1161_s26 = scalar_lea.vmem %s5390_s18, %s4866_s0 }
  0x4d   : > { %s4153_s1 = sshll.u32 %s4866_s0, 4  ;;  %s4908_s6 = scalar_lea.vmem %s4847_s29, %s4149_s22 }
  0x4e   : > { %s4911_s2 = scalar_lea.vmem %s5392_s28, %s4153_s1  ;;  %s4914_s12 = scalar_lea.vmem %s4837_s5, %s4153_s1 }
  0x4f   : > { %s4917_s21 = scalar_lea.vmem %s4852_s25, %s4149_s22  ;;  %s5393_s7 = sld [smem:[#allocation26_spill]] }
  0x55   : > { %p4063_p4 = scmp.ne.s32.totalorder %s5393_s7, 0 }
  0x56   : > { %s5394_s16 = sld [smem:[#allocation6_spill]] (!%p4063_p4) }
  0x57   : > { %1185 = sbr.rel (%p4063_p4) target bundleno = 94 (0x5e), region = 132 }
  0x5c   : > { %v1186_v0 = vld [vmem:[%s5394_s16] sm:$0xff]  ;;  %vm1188_vm0 = vcmask 261120   ;;  %v1187_v1 = vld [vmem:[%s5394_s16 + $0x8] sm:$0xff] }
  0x5d   : > { %1189 = vst.msk [vmem:[#allocation2] sm:$0xff] %vm1188_vm0, %v1186_v0  ;;  %1190 = vst.msk [vmem:[#allocation2 + $0x8] sm:$0xff] %vm1188_vm0, %v1187_v1 }
  0x5e PF: > { %vm1195_vm1 = vcmask 261120   ;;  %s5395_s30 = sld [smem:[#allocation27_spill]]  ;;  %vm1454_vm2 = vcmask 1043456   ;;  %vm1441_vm3 = vcmask 31744   ;;  %vm4690_vm4 = vmmov 0  }
  0x5f   : > { %s5396_s7 = sld [smem:[#allocation11_spill]]  ;;  %vm1923_vm5 = vcmask 64512   ;;  %vm2603_vm6 = vcmask 130048   ;;  %vm3017_vm7 = vcmask 195584  }
  0x60   : > { %s5398_s18 = sld [smem:[#allocation15_spill]] }
  0x61   : > { %s5399_s22 = sld [smem:[#allocation16_spill]] }
  0x64   : > { %v1191_v2 = vld [vmem:[#allocation2] sm:$0xff]  ;;  %v1192_v3 = vld [vmem:[#allocation2 + $0x8] sm:$0xff]  ;;  %v1242_v16 = vld [vmem:[%s5395_s30 + $0x18] sm:$0xff] }
  0x65   : > { %v1196_v4 = vsel %vm1195_vm1, %v1191_v2, 0.0  ;;  %v1199_v5 = vsel %vm1195_vm1, %v1192_v3, 0.0  ;;  %s5397_s15 = smov %s5396_s7  ;;  %v1241_v17 = vld [vmem:[%s5395_s30 + $0x10] sm:$0xff]  ;;  %4275 = vmatprep.subr.mxu0 %v1242_v16  ;;  %v1240_v18 = vld [vmem:[%s5395_s30 + $0x8] sm:$0xff]  ;;  %v1239_v19 = vld [vmem:[%s5395_s30] sm:$0xff]  ;;  %s5402_s30 = sld [smem:[#allocation18_spill]] }
  0x66   : > { %1197 = vadd.xlane.f32.xlu0 %v1196_v4  ;;  %4276 = vmatpush3.msra.mxu0 %v1242_v16  ;;  %v1334_v20 = vld [vmem:[%s5396_s7 + $0x18] sm:$0xff]  ;;  %s5400_s28 = scalar_lea.vmem %s5398_s18, %s4866_s0  ;;  %v1333_v37 = vld [vmem:[%s5397_s15 + $0x10] sm:$0xff]  ;;  %v1332_v38 = vld [vmem:[%s5397_s15 + $0x8] sm:$0xff]  ;;  %s5403_s7 = sld [smem:[#allocation12_spill]] }
  0x67   : > { %4277 = vmatprep.subr.mxu0 %v1241_v17  ;;  %4308 = vmatprep.subr.mxu1 %v1334_v20  ;;  %v4064_v28 = vld [vmem:[%s5400_s28] ss:$0 sm:$0xff]  ;;  %s5401_s1 = scalar_lea.vmem %s5399_s22, %s4866_s0  ;;  %s4687_s22 = smov 96  }
  0x68   : > { %4278 = vmatpush3.msra.mxu0 %v1241_v17  ;;  %4309 = vmatpush3.msra.mxu1 %v1334_v20  ;;  %v4065_v30 = vld [vmem:[%s5401_s1] ss:$0 sm:$0xff]  ;;  %s5405_s28 = sld [smem:[#allocation10_spill]] }
  0x69   : > { %4279 = vmatprep.subr.mxu0 %v1240_v18  ;;  %4310 = vmatprep.subr.mxu1 %v1333_v37  ;;  %v1331_v39 = vld [vmem:[%s5397_s15] sm:$0xff]  ;;  %s5406_s1 = sld [smem:[#allocation19_spill]] }
  0x6a   : > { %1200 = vadd.xlane.f32.xlu0 %v1199_v5  ;;  %4280 = vmatpush3.msra.mxu0 %v1240_v18 }
  0x6b   : > { %4281 = vmatprep.subr.mxu0 %v1239_v19  ;;  %4311 = vmatpush3.msra.mxu1 %v1333_v37  ;;  %s5404_s18 = scalar_lea.vmem %s5402_s30, %s4866_s0  ;;  %s5407_s30 = sld [smem:[#allocation20_spill]] }
  0x6c   : > { %4282 = vmatpush3.msra.mxu0 %v1239_v19  ;;  %4312 = vmatprep.subr.mxu1 %v1332_v38  ;;  %v4066_v40 = vld [vmem:[%s5404_s18] ss:$0 sm:$0xff] }
  0x6d   : > { %4286 = vmatprep.subr.mxu0 %v1334_v20  ;;  %4313 = vmatpush3.msra.mxu1 %v1332_v38  ;;  %v1335_v45 = vld [vmem:[%s5403_s7] sm:$0xf] }
  0x6e   : > { %4314 = vmatprep.subr.mxu1 %v1331_v39 }
  0x6f   : > { %4315 = vmatpush3.msra.mxu1 %v1331_v39  ;;  %s5408_s7 = scalar_lea.vmem %s5406_s1, %s4866_s0  ;;  %s5411_s1 = scalar_lea.vmem %s4787_s27, %s4866_s0 }
  0x71   : > { %s5409_s18 = scalar_lea.vmem %s5407_s30, %s4866_s0  ;;  %s5412_s30 = sld [smem:[#allocation8_spill]] }
  0xef   : > { %v1198_v6 = vpop.xlane.xlu0 %1197 }
  0xf0   : > { %v1203_v7 = vmul.f32 0.03125, %v1198_v6 }
  0xf2   : > { %v1205_v8 = vsub.f32 %v1191_v2, %v1203_v7 }
  0xf3   : > { %v1201_v9 = vpop.xlane.xlu0 %1200 }
  0xf4   : > { %v1204_v10 = vmul.f32 0.03125, %v1201_v9  ;;  %v1207_v11 = vmul.f32 %v1205_v8, %v1205_v8  ;;  %v1803_v9 = vld [vmem:[%s5405_s28 + $0x10] sm:$0xff] }
  0xf6   : > { %v1206_v12 = vsub.f32 %v1192_v3, %v1204_v10  ;;  %v1209_v13 = vsel %vm1195_vm1, %v1207_v11, 0.0  ;;  %v1802_v10 = vld [vmem:[%s5405_s28 + $0x8] sm:$0xff]  ;;  %v1801_v11 = vld [vmem:[%s5405_s28] sm:$0xff] }
  0xf7   : > { %1210 = vadd.xlane.f32.xlu1 %v1209_v13 }
  0xf8   : > { %v1208_v14 = vmul.f32 %v1206_v12, %v1206_v12 }
  0xfa   : > { %v1212_v15 = vsel %vm1195_vm1, %v1208_v14, 0.0 }
  0xfb   : > { %1213 = vadd.xlane.f32.xlu1 %v1212_v15 }
 0x180   : > { %v1211_v21 = vpop.xlane.xlu1 %1210 }
 0x181   : > { %v1215_v22 = vmul.f32 0.03125, %v1211_v21 }
 0x183   : > { %v1217_v23 = vadd.f32 1e-05, %v1215_v22  ;;  %v4087_v22 = vld [vmem:[%s5408_s7] ss:$0 sm:$0xff]  ;;  %s5413_s7 = sld [smem:[#allocation9_spill]] }
 0x184   : > { %v1214_v24 = vpop.xlane.xlu1 %1213 }
 0x185   : > { %4568 = vrsqrt.f32 %v1217_v23  ;;  %v1216_v25 = vmul.f32 0.03125, %v1214_v24 }
 0x187   : > { %v1218_v26 = vadd.f32 1e-05, %v1216_v25 }
 0x189   : > { %4570 = vrsqrt.f32 %v1218_v26 }
 0x192   : > { %v4569_v27 = vpop.eup %4568 }
 0x193   : > { %v1221_v29 = vmul.f32 %v4569_v27, %v1205_v8  ;;  %v1804_v8 = vld [vmem:[%s5405_s28 + $0x18] sm:$0xff]  ;;  %v4088_v27 = vld [vmem:[%s5409_s18] ss:$0 sm:$0xff]  ;;  %s5414_s18 = smov %s5413_s7 }
 0x194   : > { %4330 = vmatprep.subr.mxu1 %v1804_v8 }
 0x195   : > { %v1229_v31 = vmul.f32 %v4064_v28, %v1221_v29 }
 0x196   : > { %v4571_v32 = vpop.eup %4570 }
 0x197   : > { %v1222_v33 = vmul.f32 %v4571_v32, %v1206_v12  ;;  %v1237_v34 = vadd.f32 %v4065_v30, %v1229_v31 }
 0x199   : > { %v1230_v35 = vmul.f32 %v4064_v28, %v1222_v33  ;;  %4283 = vmatprep.mubr.msk.f32.mxu0 %vm1195_vm1, %v1237_v34 }
 0x19b   : > { %v1238_v36 = vadd.f32 %v4065_v30, %v1230_v35 }
 0x19d   : > { %4284 = vmatmul.mubr.msk.f32.vlgmr.msra.gmra.mxu0 %vm1195_vm1, %v1238_v36 }
 0x19e   : > { %4287 = vmatpush3.msra.mxu0 %v1334_v20 }
 0x19f   : > { %4288 = vmatprep.subr.mxu0 %v1333_v37 }
 0x1a0   : > { %4289 = vmatpush3.msra.mxu0 %v1333_v37 }
 0x1a1   : > { %4290 = vmatprep.subr.mxu0 %v1332_v38 }
 0x1a2   : > { %4291 = vmatpush3.msra.mxu0 %v1332_v38 }
 0x1a3   : > { %4292 = vmatprep.subr.mxu0 %v1331_v39 }
 0x1a4   : > { %4293 = vmatpush3.msra.mxu0 %v1331_v39 }
 0x1a5   : > { %4300 = vmatprep.subr.msk.mxu0 %vm1454_vm2, %v1335_v45 }
 0x25d   : > { %v4285_v41 = vpop.f32.mrf.mxu0 }
 0x25e   : > { %v4945_v42 = vadd.f32 %v4285_v41, %v4066_v40  ;;  %v4090_v41 = vld [vmem:[%s5411_s1] ss:$0 sm:$0xff]  ;;  %s4692_s1 = smov 104  }
 0x25f   : > { %v1322_v43 = vpop.f32.mrf.mxu0 }
 0x260   : > { %v4947_v44 = vadd.f32 %v4066_v40, %v1322_v43  ;;  %1340 = vrot.lane.b32.xlu1 %v4945_v42, %s4687_s22 }
 0x262   : > { %1338 = vrot.lane.b32.xlu0 %v4947_v44, %s4687_s22  ;;  %4294 = vmatprep.mubr.msk.f32.mxu0 %vm1195_vm1, %v4947_v44  ;;  %s5410_s22 = scalar_lea.vmem %s4782_s20, %s4866_s0 }
 0x263   : > { %4295 = vmatmul.mubr.msk.f32.vlgmr.msra.gmra.mxu0 %vm1195_vm1, %v4945_v42  ;;  %v4089_v35 = vld [vmem:[%s5410_s22] ss:$0 sm:$0xff]  ;;  %s4688_s22 = smov 120  }
 0x264   : > { %4301 = vmatpush3.msk.msra.mxu0 %vm1454_vm2, %v1335_v45 }
 0x265   : > { %4322 = vmatprep.subr.msk.mxu0 %vm1454_vm2, %v1335_v45 }
 0x2d2   : > { %v1341_v47 = vpop.permute.xlu1 %1340 }
 0x2d4   : > { %v1339_v46 = vpop.permute.xlu0 %1338 }
 0x2d5   : > { %4297 = vmatprep.mubr.msk.f32.mxu0 %vm1195_vm1, %v1339_v46 }
 0x2d6   : > { %4298 = vmatmul.mubr.msk.f32.gmra.mxu0 %vm1195_vm1, %v1341_v47 }
 0x323   : > { %v4296_v48 = vpop.f32.mrf.mxu0 }
 0x324   : > { %v1438_v51 = vmul.f32 0.125, %v4296_v48  ;;  %v5006_v48 = vld [vmem:[%s4911_s2 + $0x8] sm:$0xff] }
 0x325   : > { %v1418_v49 = vpop.f32.mrf.mxu0  ;;  %4109 = vst.msk [vmem:[%s4908_s6 + $0x10] sm:$0xff] %vm1195_vm1, %v5006_v48 }
 0x326   : > { %v1437_v50 = vmul.f32 0.125, %v1418_v49 }
 0x328   : > { %4302 = vmatprep.mubr.msk.f32.mxu0 %vm1441_vm3, %v1437_v50 }
 0x329   : > { %4303 = vmatmul.mubr.msk.f32.vlgmr.msra.gmra.mxu0 %vm1441_vm3, %v1438_v51  ;;  %v1796_v51 = vld [vmem:[%s5412_s30 + $0x18] sm:$0xff] }
 0x32a   : > { %4323 = vmatpush3.msk.msra.mxu0 %vm1454_vm2, %v1335_v45 }
 0x396   : > { %v4299_v52 = vpop.f32.mrf.mxu0 }
 0x397   : > { %v1440_v55 = vmul.f32 0.125, %v4299_v52  ;;  %v1905_v52 = vld [vmem:[%s5413_s7 + $0x18] sm:$0xff]  ;;  %s4693_s7 = smov 64  }
 0x398   : > { %v1428_v53 = vpop.f32.mrf.mxu0 }
 0x399   : > { %v1439_v54 = vmul.f32 0.125, %v1428_v53 }
 0x39b   : > { %4305 = vmatprep.mubr.msk.f32.mxu0 %vm1441_vm3, %v1439_v54  ;;  %v1795_v54 = vld [vmem:[%s5412_s30 + $0x10] sm:$0xff] }
 0x39c   : > { %4306 = vmatmul.mubr.msk.f32.gmra.mxu0 %vm1441_vm3, %v1440_v55  ;;  %v1904_v55 = vld [vmem:[%s5414_s18 + $0x10] sm:$0xff] }
 0x3e9   : > { %v4304_v56 = vpop.f32.mrf.mxu0 }
 0x3ea   : > { %v1544_v57 = vsub.f32 %v4945_v42, %v4304_v56 }
 0x3eb   : > { %v1524_v58 = vpop.f32.mrf.mxu0 }
 0x3ec   : > { %v1543_v59 = vsub.f32 %v4947_v44, %v1524_v58  ;;  %v1548_v61 = vmul.f32 %v1544_v57, %v1544_v57  ;;  %v1902_v58 = vld [vmem:[%s5414_s18] sm:$0xff] }
 0x3ee   : > { %v1547_v60 = vmul.f32 %v1543_v59, %v1543_v59 }
 0x3f0   : > { %4316 = vmatprep.mubr.msk.f32.mxu1 %vm1195_vm1, %v1547_v60 }
 0x3f1   : > { %4317 = vmatmul.mubr.msk.f32.vlgmr.msra.gmra.mxu1 %vm1195_vm1, %v1548_v61 }
 0x3f2   : > { %4331 = vmatpush3.msra.mxu1 %v1804_v8 }
 0x3f3   : > { %4332 = vmatprep.subr.mxu1 %v1803_v9 }
 0x3f4   : > { %4333 = vmatpush3.msra.mxu1 %v1803_v9 }
 0x3f5   : > { %4334 = vmatprep.subr.mxu1 %v1802_v10 }
 0x3f6   : > { %4335 = vmatpush3.msra.mxu1 %v1802_v10 }
 0x3f7   : > { %4336 = vmatprep.subr.mxu1 %v1801_v11 }
 0x3f8   : > { %4337 = vmatpush3.msra.mxu1 %v1801_v11 }
 0x45c   : > { %v4307_v62 = vpop.f32.mrf.mxu0 }
 0x45d   : > { %v1546_v63 = vsub.f32 %v1341_v47, %v4307_v62  ;;  %v4689_v47 = vmov 0.0  }
 0x45e   : > { %v1534_v0 = vpop.f32.mrf.mxu0  ;;  %4344 = vmatprep.subr.mxu0 %v4689_v47  ;;  %4351 = vmatprep.subr.mxu1 %v4689_v47 }
 0x45f   : > { %v1545_v1 = vsub.f32 %v1339_v46, %v1534_v0  ;;  %v1550_v3 = vmul.f32 %v1546_v63, %v1546_v63  ;;  %v1914_v46 = vld [vmem:[%s4911_s2] sm:$0xff]  ;;  %s4691_s2 = smov 112  }
 0x460   : > { %1919 = vst.msk [vmem:[%s4908_s6] sm:$0xff] %vm1195_vm1, %v1914_v46  ;;  %2005 = vrot.lane.b32.xlu1 %v1914_v46, %s4688_s22 }
 0x461   : > { %v1549_v2 = vmul.f32 %v1545_v1, %v1545_v1 }
 0x463   : > { %4319 = vmatprep.mubr.msk.f32.mxu1 %vm1195_vm1, %v1549_v2 }
 0x464   : > { %4320 = vmatmul.mubr.msk.f32.gmra.mxu1 %vm1195_vm1, %v1550_v3 }
 0x4b1   : > { %v4318_v4 = vpop.f32.mrf.mxu1 }
 0x4b2   : > { %v1649_v7 = vmul.f32 0.125, %v4318_v4  ;;  %v1903_v4 = vld [vmem:[%s5414_s18 + $0x8] sm:$0xff] }
 0x4b3   : > { %v1629_v5 = vpop.f32.mrf.mxu1 }
 0x4b4   : > { %v1648_v6 = vmul.f32 0.125, %v1629_v5  ;;  %v1794_v5 = vld [vmem:[%s5412_s30 + $0x8] sm:$0xff] }
 0x4b6   : > { %4324 = vmatprep.mubr.msk.f32.mxu0 %vm1441_vm3, %v1648_v6 }
 0x4b7   : > { %4325 = vmatmul.mubr.msk.f32.vlgmr.msra.gmra.mxu0 %vm1441_vm3, %v1649_v7 }
 0x4d2   : > { %v2006_v9 = vpop.permute.xlu1 %2005 }
 0x524   : > { %v4321_v12 = vpop.f32.mrf.mxu1 }
 0x525   : > { %v1651_v15 = vmul.f32 0.125, %v4321_v12 }
 0x526   : > { %v1639_v13 = vpop.f32.mrf.mxu1 }
 0x527   : > { %v1650_v14 = vmul.f32 0.125, %v1639_v13 }
 0x529   : > { %4327 = vmatprep.mubr.msk.f32.mxu0 %vm1441_vm3, %v1650_v14 }
 0x52a   : > { %4328 = vmatmul.mubr.msk.f32.gmra.mxu0 %vm1441_vm3, %v1651_v15 }
 0x52b   : > { %4348 = vmatprep.mubr.msk.f32.mxu0 %vm4690_vm4, %v4689_v47 }
 0x577   : > { %v4326_v16 = vpop.f32.mrf.mxu0 }
 0x578   : > { %v1736_v17 = vadd.f32 1e-05, %v4326_v16 }
 0x579   : > { %v1730_v18 = vpop.f32.mrf.mxu0 }
 0x57a   : > { %4572 = vrsqrt.f32 %v1736_v17  ;;  %v1731_v19 = vadd.f32 1e-05, %v1730_v18 }
 0x57c   : > { %4574 = vrsqrt.f32 %v1731_v19 }
 0x587   : > { %v4573_v20 = vpop.eup %4572 }
 0x588   : > { %v1754_v21 = vmul.f32 %v4573_v20, %v1544_v57 }
 0x589   : > { %v4575_v23 = vpop.eup %4574 }
 0x58a   : > { %v1753_v24 = vmul.f32 %v4575_v23, %v1543_v59  ;;  %v1765_v25 = vmul.f32 %v4087_v22, %v1754_v21 }
 0x58c   : > { %v1764_v26 = vmul.f32 %v4087_v22, %v1753_v24  ;;  %v4982_v29 = vadd.f32 %v4088_v27, %v1765_v25 }
 0x58e   : > { %v1773_v28 = vadd.f32 %v4088_v27, %v1764_v26  ;;  %v1798_v7 = vmul.f32 %v1794_v5, %v4982_v29 }
 0x590   : > { %4338 = vmatprep.mubr.msk.f32.mxu1 %vm1195_vm1, %v1773_v28 }
 0x591   : > { %4339 = vmatmul.mubr.msk.f32.vlgmr.msra.gmra.mxu1 %vm1195_vm1, %v4982_v29 }
 0x5ea   : > { %v4329_v30 = vpop.f32.mrf.mxu0 }
 0x5eb   : > { %v1746_v31 = vadd.f32 1e-05, %v4329_v30 }
 0x5ec   : > { %v1740_v32 = vpop.f32.mrf.mxu0 }
 0x5ed   : > { %4576 = vrsqrt.f32 %v1746_v31  ;;  %v1741_v33 = vadd.f32 1e-05, %v1740_v32  ;;  %v5114_v32 = vld [vmem:[%s4914_s12] sm:$0xff] }
 0x5ee   : > { %1921 = vst.msk [vmem:[%s4917_s21] sm:$0xff] %vm1195_vm1, %v5114_v32 }
 0x5ef   : > { %4578 = vrsqrt.f32 %v1741_v33 }
 0x5fa   : > { %v4577_v34 = vpop.eup %4576 }
 0x5fb   : > { %v1756_v36 = vmul.f32 %v4577_v34, %v1546_v63  ;;  %v1793_v63 = vld [vmem:[%s5412_s30] sm:$0xff] }
 0x5fc   : > { %v4579_v37 = vpop.eup %4578  ;;  %v1797_v2 = vmul.f32 %v1793_v63, %v1773_v28 }
 0x5fd   : > { %v1755_v38 = vmul.f32 %v4579_v37, %v1545_v1  ;;  %v1783_v39 = vmul.f32 %v4089_v35, %v1756_v36 }
 0x5ff   : > { %v1782_v40 = vmul.f32 %v4089_v35, %v1755_v38  ;;  %v1792_v45 = vadd.f32 %v4090_v41, %v1783_v39 }
 0x601   : > { %v1791_v43 = vadd.f32 %v4090_v41, %v1782_v40  ;;  %v1800_v56 = vmul.f32 %v1796_v51, %v1792_v45 }
 0x603   : > { %4341 = vmatprep.mubr.msk.f32.mxu1 %vm1195_vm1, %v1791_v43  ;;  %v1799_v61 = vmul.f32 %v1795_v54, %v1791_v43 }
 0x604   : > { %4342 = vmatmul.mubr.msk.f32.gmra.mxu1 %vm1195_vm1, %v1792_v45 }
 0x605   : > { %4355 = vmatprep.mubr.msk.f32.mxu1 %vm4690_vm4, %v4689_v47 }
 0x651   : > { %v4340_v49 = vpop.f32.mrf.mxu1 }
 0x652   : > { %v1907_v6 = vmul.f32 %v4340_v49, %v1903_v4  ;;  %v5151_v4 = vld [vmem:[%s4914_s12 + $0x8] sm:$0xff]  ;;  %s4695_s12 = smov 16  }
 0x653   : > { %v1883_v50 = vpop.f32.mrf.mxu1  ;;  %4111 = vst.msk [vmem:[%s4917_s21 + $0x10] sm:$0xff] %vm1195_vm1, %v5151_v4 }
 0x654   : > { %v1906_v0 = vmul.f32 %v1902_v58, %v1883_v50  ;;  %v1911_v8 = vadd.f32 %v1907_v6, %v1798_v7 }
 0x656   : > { %v1910_v3 = vadd.f32 %v1906_v0, %v1797_v2 }
 0x6c4   : > { %v4343_v53 = vpop.f32.mrf.mxu1 }
 0x6c5   : > { %v1909_v57 = vmul.f32 %v4343_v53, %v1905_v52 }
 0x6c6   : > { %v1893_v59 = vpop.f32.mrf.mxu1 }
 0x6c7   : > { %v5016_v60 = vadd.f32 %v1909_v57, %v1800_v56  ;;  %v1908_v62 = vmul.f32 %v1904_v55, %v1893_v59 }
 0x6c9   : > { %4110 = vst.msk [vmem:[%s4908_s6 + $0x18] sm:$0xff] %vm1195_vm1, %v5016_v60  ;;  %v1912_v1 = vadd.f32 %v1908_v62, %v1799_v61 }
 0x6cb   : > { %1920 = vst.msk [vmem:[%s4908_s6 + $0x8] sm:$0xff] %vm1195_vm1, %v1912_v1  ;;  %2089 = vrot.lane.b32.xlu0 %v1912_v1, %s4691_s2  ;;  %2007 = vrot.lane.b32.xlu1 %v1912_v1, %s4688_s22  ;;  %s5415_s6 = sld [smem:[#allocation7_spill]] }
 0x6cc   : > { %4345 = vmatpush3.xpose.msk.msra.mxu0 %vm1923_vm5, %v1912_v1 }
 0x6cd   : > { %4346 = vmatprep.subr.mxu0 %v4689_v47 }
 0x6cf   : > { %2171 = vrot.lane.b32.xlu0 %v1912_v1, %s4692_s1  ;;  %2003 = vrot.lane.b32.xlu1 %v1910_v3, %s4688_s22 }
 0x6d0   : > { %4347 = vmatpush3.xpose.msk.msra.mxu0 %vm1923_vm5, %v1914_v46 }
 0x6d1   : > { %4358 = vmatprep.subr.mxu0 %v4689_v47  ;;  %v2587_v27 = vld [vmem:[%s5415_s6] sm:$0xff]  ;;  %v2588_v33 = vld [vmem:[%s5415_s6 + $0x8] sm:$0xff]  ;;  %v2589_v38 = vld [vmem:[%s5415_s6 + $0x10] sm:$0xff] }
 0x6d2   : > { %v2590_v40 = vld [vmem:[%s5415_s6 + $0x18] sm:$0xff]  ;;  %v2591_v51 = vld [vmem:[%s5415_s6 + $0x20] sm:$0xff]  ;;  %v2592_v54 = vld [vmem:[%s5415_s6 + $0x28] sm:$0xff] }
 0x6d3   : > { %4349 = vmatmul.mubr.msk.f32.vlgmr.msra.gmra.mxu0 %vm1923_vm5, %v1910_v3  ;;  %2169 = vrot.lane.b32.xlu0 %v1914_v46, %s4692_s1  ;;  %v2593_v61 = vld [vmem:[%s5415_s6 + $0x30] sm:$0xff]  ;;  %v2594_v5 = vld [vmem:[%s5415_s6 + $0x38] sm:$0xff] }
 0x6d4   : > { %2087 = vrot.lane.b32.xlu1 %v1914_v46, %s4691_s2  ;;  %4362 = vmatprep.mubr.msk.f32.mxu0 %vm4690_vm4, %v4689_v47 }
 0x6d7   : > { %2167 = vrot.lane.b32.xlu0 %v1910_v3, %s4692_s1 }
 0x6d8   : > { %2085 = vrot.lane.b32.xlu1 %v1910_v3, %s4691_s2 }
 0x6db   : > { %2343 = vrot.lane.b32.xlu0 %v5006_v48, %s4688_s22 }
 0x6dc   : > { %2345 = vrot.lane.b32.xlu1 %v5016_v60, %s4688_s22 }
 0x6df   : > { %2341 = vrot.lane.b32.xlu0 %v1911_v8, %s4688_s22 }
 0x6e0   : > { %2427 = vrot.lane.b32.xlu1 %v5016_v60, %s4691_s2 }
 0x6e3   : > { %2425 = vrot.lane.b32.xlu0 %v5006_v48, %s4691_s2 }
 0x6e4   : > { %2509 = vrot.lane.b32.xlu1 %v5016_v60, %s4692_s1 }
 0x6e7   : > { %2423 = vrot.lane.b32.xlu0 %v1911_v8, %s4691_s2 }
 0x6e8   : > { %2507 = vrot.lane.b32.xlu1 %v5006_v48, %s4692_s1 }
 0x6ec   : > { %2505 = vrot.lane.b32.xlu1 %v1911_v8, %s4692_s1 }
 0x73d   : > { %v2090_v10 = vpop.permute.xlu0 %2089  ;;  %v2008_v11 = vpop.permute.xlu1 %2007 }
 0x73e   : > { %4352 = vmatpush3.xpose.msk.msra.mxu1 %vm1923_vm5, %v2008_v11  ;;  %4359 = vmatpush3.xpose.msk.msra.mxu0 %vm1923_vm5, %v2090_v10 }
 0x73f   : > { %4353 = vmatprep.subr.mxu1 %v4689_v47  ;;  %4360 = vmatprep.subr.mxu0 %v4689_v47 }
 0x741   : > { %v2172_v12 = vpop.permute.xlu0 %2171  ;;  %v2004_v13 = vpop.permute.xlu1 %2003 }
 0x742   : > { %4354 = vmatpush3.xpose.msk.msra.mxu1 %vm1923_vm5, %v2006_v9 }
 0x743   : > { %4365 = vmatprep.subr.mxu1 %v4689_v47 }
 0x745   : > { %v2170_v14 = vpop.permute.xlu0 %2169  ;;  %4356 = vmatmul.mubr.msk.f32.vlgmr.msra.gmra.mxu1 %vm1923_vm5, %v2004_v13 }
 0x746   : > { %v2088_v15 = vpop.permute.xlu1 %2087  ;;  %4366 = vmatpush3.xpose.msk.msra.mxu1 %vm1923_vm5, %v2172_v12  ;;  %4369 = vmatprep.mubr.msk.f32.mxu1 %vm4690_vm4, %v4689_v47 }
 0x747   : > { %4361 = vmatpush3.xpose.msk.msra.mxu0 %vm1923_vm5, %v2088_v15  ;;  %4367 = vmatprep.subr.mxu1 %v4689_v47 }
 0x748   : > { %4372 = vmatprep.subr.mxu0 %v4689_v47 }
 0x749   : > { %v2168_v16 = vpop.permute.xlu0 %2167 }
 0x74a   : > { %v2086_v17 = vpop.permute.xlu1 %2085  ;;  %4368 = vmatpush3.xpose.msk.msra.mxu1 %vm1923_vm5, %v2170_v14 }
 0x74b   : > { %4363 = vmatmul.mubr.msk.f32.vlgmr.msra.gmra.mxu0 %vm1923_vm5, %v2086_v17  ;;  %4379 = vmatprep.subr.mxu1 %v4689_v47 }
 0x74c   : > { %4373 = vmatpush3.xpose.msk.msra.mxu0 %vm1923_vm5, %v5016_v60  ;;  %4376 = vmatprep.mubr.msk.f32.mxu0 %vm4690_vm4, %v4689_v47 }
 0x74d   : > { %v2344_v18 = vpop.permute.xlu0 %2343  ;;  %4370 = vmatmul.mubr.msk.f32.vlgmr.msra.gmra.mxu1 %vm1923_vm5, %v2168_v16  ;;  %4374 = vmatprep.subr.mxu0 %v4689_v47 }
 0x74e   : > { %v2346_v19 = vpop.permute.xlu1 %2345  ;;  %4383 = vmatprep.mubr.msk.f32.mxu1 %vm4690_vm4, %v4689_v47 }
 0x74f   : > { %4380 = vmatpush3.xpose.msk.msra.mxu1 %vm1923_vm5, %v2346_v19 }
 0x750   : > { %4375 = vmatpush3.xpose.msk.msra.mxu0 %vm1923_vm5, %v5006_v48  ;;  %4381 = vmatprep.subr.mxu1 %v4689_v47 }
 0x751   : > { %v2342_v20 = vpop.permute.xlu0 %2341  ;;  %4386 = vmatprep.subr.mxu0 %v4689_v47 }
 0x752   : > { %v2428_v21 = vpop.permute.xlu1 %2427 }
 0x753   : > { %4377 = vmatmul.mubr.msk.f32.vlgmr.msra.gmra.mxu0 %vm1923_vm5, %v1911_v8  ;;  %4382 = vmatpush3.xpose.msk.msra.mxu1 %vm1923_vm5, %v2344_v18 }
 0x754   : > { %4387 = vmatpush3.xpose.msk.msra.mxu0 %vm1923_vm5, %v2428_v21  ;;  %4393 = vmatprep.subr.mxu1 %v4689_v47 }
 0x755   : > { %v2426_v22 = vpop.permute.xlu0 %2425  ;;  %4388 = vmatprep.subr.mxu0 %v4689_v47  ;;  %4390 = vmatprep.mubr.msk.f32.mxu0 %vm4690_vm4, %v4689_v47 }
 0x756   : > { %4384 = vmatmul.mubr.msk.f32.vlgmr.msra.gmra.mxu1 %vm1923_vm5, %v2342_v20  ;;  %v2510_v23 = vpop.permute.xlu1 %2509 }
 0x757   : > { %4394 = vmatpush3.xpose.msk.msra.mxu1 %vm1923_vm5, %v2510_v23  ;;  %4397 = vmatprep.mubr.msk.f32.mxu1 %vm4690_vm4, %v4689_v47 }
 0x758   : > { %4389 = vmatpush3.xpose.msk.msra.mxu0 %vm1923_vm5, %v2426_v22  ;;  %4395 = vmatprep.subr.mxu1 %v4689_v47 }
 0x759   : > { %v2424_v24 = vpop.permute.xlu0 %2423  ;;  %4400 = vmatprep.subr.mxu0 %v4689_v47 }
 0x75a   : > { %v2508_v25 = vpop.permute.xlu1 %2507 }
 0x75b   : > { %4391 = vmatmul.mubr.msk.f32.vlgmr.msra.gmra.mxu0 %vm1923_vm5, %v2424_v24  ;;  %4396 = vmatpush3.xpose.msk.msra.mxu1 %vm1923_vm5, %v2508_v25 }
 0x75c   : > { %4428 = vmatprep.subr.mxu1 %v4689_v47  ;;  %4404 = vmatprep.mubr.msk.f32.mxu0 %vm4690_vm4, %v4689_v47 }
 0x75e   : > { %v2506_v26 = vpop.permute.xlu1 %2505 }
 0x75f   : > { %4398 = vmatmul.mubr.msk.f32.vlgmr.msra.gmra.mxu1 %vm1923_vm5, %v2506_v26 }
 0x760   : > { %4432 = vmatprep.mubr.msk.f32.mxu1 %vm4690_vm4, %v4689_v47 }
 0x793   : > { %v1999_v28 = vpop.f32.mrf.mxu0 }
 0x794   : > { %v5109_v29 = vadd.f32 %v2587_v27, %v1999_v28 }
 0x795   : > { %v4350_v30 = vpop.f32.mrf.mxu0 }
 0x796   : > { %v2604_v31 = vsel %vm2603_vm6, %v5109_v29, -inf }
 0x797   : > { %2605 = vmax.xlane.f32.xlu0 %v2604_v31 }
 0x805   : > { %v2081_v34 = vpop.f32.mrf.mxu1 }
 0x806   : > { %v5120_v35 = vadd.f32 %v2588_v33, %v2081_v34 }
 0x807   : > { %v4357_v36 = vpop.f32.mrf.mxu1 }
 0x808   : > { %v2607_v37 = vsel %vm2603_vm6, %v5120_v35, -inf }
 0x809   : > { %2608 = vmax.xlane.f32.xlu1 %v2607_v37 }
 0x80b   : > { %v2163_v39 = vpop.f32.mrf.mxu0 }
 0x80c   : > { %v5126_v41 = vadd.f32 %v2589_v38, %v2163_v39 }
 0x80d   : > { %v4364_v43 = vpop.f32.mrf.mxu0  ;;  %v2245_v45 = vpop.f32.mrf.mxu1 }
 0x80e   : > { %v5128_v46 = vadd.f32 %v2590_v40, %v2245_v45  ;;  %v2610_v48 = vsel %vm2603_vm6, %v5126_v41, -inf }
 0x80f   : > { %2611 = vmax.xlane.f32.xlu0 %v2610_v48  ;;  %v4371_v49 = vpop.f32.mrf.mxu1 }
 0x810   : > { %v2613_v50 = vsel %vm2603_vm6, %v5128_v46, -inf }
 0x813   : > { %v2337_v52 = vpop.f32.mrf.mxu0  ;;  %2614 = vmax.xlane.f32.xlu0 %v2613_v50 }
 0x814   : > { %v5135_v53 = vadd.f32 %v2591_v51, %v2337_v52 }
 0x815   : > { %v4378_v55 = vpop.f32.mrf.mxu0 }
 0x816   : > { %v2419_v56 = vpop.f32.mrf.mxu1  ;;  %v2616_v57 = vsel %vm2603_vm6, %v5135_v53, -inf }
 0x817   : > { %v5140_v58 = vadd.f32 %v2592_v54, %v2419_v56  ;;  %2617 = vmax.xlane.f32.xlu0 %v2616_v57 }
 0x818   : > { %v4385_v59 = vpop.f32.mrf.mxu1 }
 0x819   : > { %v2619_v60 = vsel %vm2603_vm6, %v5140_v58, -inf }
 0x81a   : > { %2620 = vmax.xlane.f32.xlu1 %v2619_v60 }
 0x81b   : > { %v2501_v62 = vpop.f32.mrf.mxu0 }
 0x81c   : > { %v2601_v63 = vadd.f32 %v2593_v61, %v2501_v62 }
 0x81d   : > { %v4392_v0 = vpop.f32.mrf.mxu0 }
 0x81e   : > { %v2622_v1 = vsel %vm2603_vm6, %v2601_v63, -inf }
 0x81f   : > { %v2583_v2 = vpop.f32.mrf.mxu1  ;;  %2623 = vmax.xlane.f32.xlu0 %v2622_v1 }
 0x820   : > { %v5157_v6 = vadd.f32 %v2594_v5, %v2583_v2 }
 0x821   : > { %v4399_v3 = vpop.f32.mrf.mxu1 }
 0x822   : > { %v2625_v7 = vsel %vm2603_vm6, %v5157_v6, -inf }
 0x82b   : > { %2253 = vrot.lane.b32.xlu1 %v4945_v42, %s4693_s7  ;;  %v2606_v42 = vpop.xlane.xlu0 %2605 }
 0x82c   : > { %v2628_v18 = vsub.f32 %v5109_v29, %v2606_v42 }
 0x82e   : > { %v2636_v21 = vmul.f32 1.442695, %v2628_v18 }
 0x82f   : > { %2766 = vrot.lane.b32.xlu1 %v5114_v32, %s4688_s22 }
 0x835   : > { %1916 = vrot.lane.b32.xlu0 %v4947_v44, %s4693_s7 }
 0x853   : > { %2626 = vmax.xlane.f32.xlu1 %v2625_v7 }
 0x892   : > { %v2609_v10 = vpop.xlane.xlu1 %2608 }
 0x893   : > { %v2629_v15 = vsub.f32 %v5120_v35, %v2609_v10 }
 0x895   : > { %v2638_v16 = vmul.f32 1.442695, %v2629_v15 }
 0x897   : > { %4580 = vpow2.f32 %v2638_v16 }
 0x898   : > { %v2612_v8 = vpop.xlane.xlu0 %2611 }
 0x899   : > { %v2630_v17 = vsub.f32 %v5126_v41, %v2612_v8 }
 0x89b   : > { %v2640_v19 = vmul.f32 1.442695, %v2630_v17 }
 0x89c   : > { %v2615_v9 = vpop.xlane.xlu0 %2614 }
 0x89d   : > { %v2631_v22 = vsub.f32 %v5128_v46, %v2615_v9  ;;  %4582 = vpow2.f32 %v2640_v19 }
 0x89e   : > { %4584 = vpow2.f32 %v2636_v21 }
 0x89f   : > { %v2642_v25 = vmul.f32 1.442695, %v2631_v22 }
 0x8a0   : > { %v2618_v12 = vpop.xlane.xlu0 %2617 }
 0x8a1   : > { %v2632_v20 = vsub.f32 %v5135_v53, %v2618_v12 }
 0x8a3   : > { %v2621_v11 = vpop.xlane.xlu1 %2620  ;;  %v2644_v23 = vmul.f32 1.442695, %v2632_v20 }
 0x8a4   : > { %v2633_v26 = vsub.f32 %v5140_v58, %v2621_v11  ;;  %v5189_v29 = vpop.eup %4580 }
 0x8a5   : > { %4586 = vpow2.f32 %v2644_v23  ;;  %v2655_v31 = vsel %vm2603_vm6, %v5189_v29, 0.0 }
 0x8a6   : > { %4588 = vpow2.f32 %v2642_v25  ;;  %v2646_v28 = vmul.f32 1.442695, %v2633_v26  ;;  %v3348_v25 = vld [vmem:[%s4887_s10 + $0x18] sm:$0xff] }
 0x8a7   : > { %v2254_v44 = vpop.permute.xlu1 %2253 }
 0x8a8   : > { %4112 = vst.msk [vmem:[%s4917_s21 + $0x18] sm:$0xff] %vm1195_vm1, %v2254_v44  ;;  %4429 = vmatpush3.msra.mxu1 %v2254_v44  ;;  %v2624_v13 = vpop.xlane.xlu0 %2623 }
 0x8a9   : > { %4430 = vmatprep.subr.mxu1 %v4689_v47  ;;  %v2634_v24 = vsub.f32 %v2601_v63, %v2624_v13 }
 0x8aa   : > { %4431 = vmatpush3.msra.mxu1 %v5151_v4 }
 0x8ab   : > { %4442 = vmatprep.subr.mxu1 %v4689_v47  ;;  %v2648_v27 = vmul.f32 1.442695, %v2634_v24  ;;  %v5191_v30 = vpop.permute.xlu1 %2766 }
 0x8ac   : > { %v1917_v14 = vpop.permute.xlu0 %1916 }
 0x8ad   : > { %1922 = vst.msk [vmem:[%s4917_s21 + $0x8] sm:$0xff] %vm1195_vm1, %v1917_v14  ;;  %4401 = vmatpush3.msra.mxu0 %v1917_v14  ;;  %2847 = vrot.lane.b32.xlu1 %v1917_v14, %s4691_s2  ;;  %4590 = vpow2.f32 %v2648_v27  ;;  %s4694_s21 = smov 8  }
 0x8ae   : > { %2768 = vrot.lane.b32.xlu0 %v1917_v14, %s4688_s22  ;;  %4402 = vmatprep.subr.mxu0 %v4689_v47  ;;  %4592 = vpow2.f32 %v2646_v28  ;;  %v3347_v28 = vld [vmem:[%s4887_s10 + $0x10] sm:$0xff] }
 0x8af   : > { %4403 = vmatpush3.msra.mxu0 %v5114_v32 }
 0x8b0   : > { %4407 = vmatprep.subr.mxu0 %v4689_v47 }
 0x8b1   : > { %2845 = vrot.lane.b32.xlu1 %v5114_v32, %s4691_s2 }
 0x8b2   : > { %2926 = vrot.lane.b32.xlu0 %v1917_v14, %s4692_s1 }
 0x8b5   : > { %2924 = vrot.lane.b32.xlu1 %v5114_v32, %s4692_s1  ;;  %v5195_v32 = vpop.eup %4582 }
 0x8b6   : > { %3095 = vrot.lane.b32.xlu0 %v2254_v44, %s4688_s22  ;;  %v4585_v33 = vpop.eup %4584  ;;  %v2658_v35 = vsel %vm2603_vm6, %v5195_v32, 0.0 }
 0x8b7   : > { %v4587_v36 = vpop.eup %4586  ;;  %v2652_v41 = vsel %vm2603_vm6, %v4585_v33, 0.0 }
 0x8b8   : > { %v5200_v39 = vpop.eup %4588  ;;  %v2664_v40 = vsel %vm2603_vm6, %v4587_v36, 0.0 }
 0x8b9   : > { %3093 = vrot.lane.b32.xlu1 %v5151_v4, %s4688_s22  ;;  %v2661_v46 = vsel %vm2603_vm6, %v5200_v39, 0.0  ;;  %s4696_s22 = smov 24  }
 0x8ba   : > { %3174 = vrot.lane.b32.xlu0 %v2254_v44, %s4691_s2  ;;  %v4591_v43 = vpop.eup %4590 }
 0x8bb   : > { %v2670_v45 = vsel %vm2603_vm6, %v4591_v43, 0.0  ;;  %v5207_v48 = vpop.eup %4592 }
 0x8bc   : > { %v2667_v49 = vsel %vm2603_vm6, %v5207_v48, 0.0 }
 0x8bd   : > { %3253 = vrot.lane.b32.xlu1 %v2254_v44, %s4692_s1 }
 0x8d9   : > { %2656 = vadd.xlane.f32.xlu0 %v2655_v31 }
 0x8dc   : > { %v2627_v34 = vpop.xlane.xlu1 %2626 }
 0x8dd   : > { %v2635_v37 = vsub.f32 %v5157_v6, %v2627_v34  ;;  %2659 = vadd.xlane.f32.xlu0 %v2658_v35 }
 0x8df   : > { %v2650_v38 = vmul.f32 1.442695, %v2635_v37 }
 0x8e1   : > { %4594 = vpow2.f32 %v2650_v38  ;;  %2665 = vadd.xlane.f32.xlu0 %v2664_v40  ;;  %2653 = vadd.xlane.f32.xlu1 %v2652_v41 }
 0x8e5   : > { %2671 = vadd.xlane.f32.xlu0 %v2670_v45  ;;  %2662 = vadd.xlane.f32.xlu1 %v2661_v46 }
 0x8e9   : > { %2668 = vadd.xlane.f32.xlu1 %v2667_v49 }
 0x8ee   : > { %v5211_v50 = vpop.eup %4594 }
 0x8ef   : > { %v2673_v51 = vsel %vm2603_vm6, %v5211_v50, 0.0 }
 0x8f0   : > { %2674 = vadd.xlane.f32.xlu1 %v2673_v51 }
 0x8fb   : > { %3172 = vrot.lane.b32.xlu0 %v5151_v4, %s4691_s2 }
 0x901   : > { %3251 = vrot.lane.b32.xlu1 %v5151_v4, %s4692_s1 }
 0x91f   : > { %v2848_v53 = vpop.permute.xlu1 %2847 }
 0x920   : > { %v2769_v52 = vpop.permute.xlu0 %2768 }
 0x923   : > { %v2846_v55 = vpop.permute.xlu1 %2845 }
 0x924   : > { %v2927_v54 = vpop.permute.xlu0 %2926 }
 0x927   : > { %v2925_v57 = vpop.permute.xlu1 %2924 }
 0x928   : > { %v3096_v56 = vpop.permute.xlu0 %3095 }
 0x92b   : > { %v3094_v59 = vpop.permute.xlu1 %3093 }
 0x92c   : > { %v3175_v58 = vpop.permute.xlu0 %3174 }
 0x92f   : > { %v5219_v61 = vpop.permute.xlu1 %3253 }
 0x962   : > { %v2657_v60 = vpop.xlane.xlu0 %2656 }
 0x966   : > { %v2660_v62 = vpop.xlane.xlu0 %2659 }
 0x96a   : > { %v2666_v63 = vpop.xlane.xlu0 %2665  ;;  %v2654_v0 = vpop.xlane.xlu1 %2653 }
 0x96b   : > { %4596 = vrcp.f32 %v2666_v63 }
 0x96c   : > { %4598 = vrcp.f32 %v2654_v0 }
 0x96d   : > { %4600 = vrcp.f32 %v2657_v60 }
 0x96e   : > { %v2672_v1 = vpop.xlane.xlu0 %2671  ;;  %v2663_v2 = vpop.xlane.xlu1 %2662 }
 0x96f   : > { %4602 = vrcp.f32 %v2672_v1 }
 0x970   : > { %4604 = vrcp.f32 %v2660_v62  ;;  %v4617_v62 = vld [vmem:[#allocation2] sm:$0xff] }
 0x971   : > { %4606 = vrcp.f32 %v2663_v2 }
 0x972   : > { %v2669_v4 = vpop.xlane.xlu1 %2668  ;;  %v3173_v8 = vpop.permute.xlu0 %3172 }
 0x973   : > { %4608 = vrcp.f32 %v2669_v4 }
 0x978   : > { %v4597_v3 = vpop.eup %4596 }
 0x979   : > { %v4599_v5 = vpop.eup %4598  ;;  %v2688_v6 = vmul.f32 %v4597_v3, %v4587_v36  ;;  %v2675_v10 = vpop.xlane.xlu1 %2674 }
 0x97a   : > { %v2684_v7 = vmul.f32 %v4599_v5, %v4585_v33  ;;  %v4601_v42 = vpop.eup %4600  ;;  %4610 = vrcp.f32 %v2675_v10 }
 0x97b   : > { %4433 = vmatmul.mubr.msk.f32.vlgmr.msra.gmra.mxu1 %vm2603_vm6, %v2688_v6  ;;  %v2685_v12 = vmul.f32 %v4601_v42, %v5189_v29  ;;  %v3346_v29 = vld [vmem:[%s4887_s10 + $0x8] sm:$0xff] }
 0x97c   : > { %v4603_v9 = vpop.eup %4602  ;;  %4443 = vmatpush3.msra.mxu1 %v3175_v58  ;;  %4405 = vmatmul.mubr.msk.f32.vlgmr.msra.gmra.mxu0 %vm2603_vm6, %v2684_v7 }
 0x97d   : > { %4408 = vmatpush3.msra.mxu0 %v2769_v52  ;;  %4444 = vmatprep.subr.mxu1 %v4689_v47  ;;  %v2690_v11 = vmul.f32 %v4603_v9, %v4591_v43  ;;  %v4605_v44 = vpop.eup %4604  ;;  %v3252_v19 = vpop.permute.xlu1 %3251 }
 0x97e   : > { %4409 = vmatprep.subr.mxu0 %v4689_v47  ;;  %4445 = vmatpush3.msra.mxu1 %v3173_v8  ;;  %v2686_v13 = vmul.f32 %v4605_v44, %v5195_v32  ;;  %v4607_v14 = vpop.eup %4606  ;;  %v3345_v32 = vld [vmem:[%s4887_s10] sm:$0xff]  ;;  %v3484_v44 = vld [vmem:[%s4896_s19 + $0x8] sm:$0xff] }
 0x97f   : > { %4410 = vmatpush3.msra.mxu0 %v5191_v30  ;;  %4446 = vmatprep.mubr.msk.f32.mxu1 %vm4690_vm4, %v4689_v47  ;;  %v2687_v15 = vmul.f32 %v4607_v14, %v5200_v39  ;;  %v3594_v14 = vld [vmem:[%s4902_s24 + $0x78] sm:$0xff] }
 0x980   : > { %4411 = vmatprep.mubr.msk.f32.mxu0 %vm4690_vm4, %v4689_v47  ;;  %4414 = vmatprep.subr.mxu0 %v4689_v47  ;;  %v4609_v16 = vpop.eup %4608 }
 0x981   : > { %4447 = vmatmul.mubr.msk.f32.vlgmr.msra.gmra.mxu1 %vm2603_vm6, %v2690_v11  ;;  %4412 = vmatmul.mubr.msk.f32.vlgmr.msra.gmra.mxu0 %vm2603_vm6, %v2685_v12  ;;  %v2689_v17 = vmul.f32 %v4609_v16, %v5207_v48  ;;  %v3486_v11 = vld [vmem:[%s4896_s19 + $0x18] sm:$0xff]  ;;  %v3485_v12 = vld [vmem:[%s4896_s19 + $0x10] sm:$0xff]  ;;  %v3592_v16 = vld [vmem:[%s4902_s24 + $0x68] sm:$0xff] }
 0x982   : > { %4415 = vmatpush3.msra.mxu0 %v2848_v53  ;;  %4418 = vmatprep.mubr.msk.f32.mxu0 %vm4690_vm4, %v4689_v47 }
 0x983   : > { %4416 = vmatprep.subr.mxu0 %v4689_v47  ;;  %4456 = vmatprep.subr.mxu1 %v3348_v25 }
 0x984   : > { %4417 = vmatpush3.msra.mxu0 %v2846_v55  ;;  %4457 = vmatpush3.msra.mxu1 %v3348_v25  ;;  %v4133_v55 = vld [vmem:[%s1139_s11] ss:$0 sm:$0xff] }
 0x985   : > { %4421 = vmatprep.subr.mxu0 %v4689_v47  ;;  %4419 = vmatmul.mubr.msk.f32.vlgmr.msra.gmra.mxu0 %vm2603_vm6, %v2686_v13  ;;  %v3483_v13 = vld [vmem:[%s4896_s19] sm:$0xff]  ;;  %s5416_s19 = scalar_lea.vmem %s4807_s9, %s4866_s0 }
 0x986   : > { %4422 = vmatpush3.msra.mxu0 %v2927_v54  ;;  %4425 = vmatprep.mubr.msk.f32.mxu0 %vm4690_vm4, %v4689_v47 }
 0x987   : > { %4423 = vmatprep.subr.mxu0 %v4689_v47  ;;  %v4611_v18 = vpop.eup %4610  ;;  %4458 = vmatprep.subr.mxu1 %v3347_v28 }
 0x988   : > { %4424 = vmatpush3.msra.mxu0 %v2925_v57  ;;  %v2691_v20 = vmul.f32 %v4611_v18, %v5211_v50  ;;  %4459 = vmatpush3.msra.mxu1 %v3347_v28  ;;  %v3590_v18 = vld [vmem:[%s4902_s24 + $0x58] sm:$0xff] }
 0x989   : > { %4435 = vmatprep.subr.mxu0 %v4689_v47  ;;  %4426 = vmatmul.mubr.msk.f32.vlgmr.msra.gmra.mxu0 %vm2603_vm6, %v2687_v15  ;;  %v3593_v15 = vld [vmem:[%s4902_s24 + $0x70] sm:$0xff] }
 0x98a   : > { %4436 = vmatpush3.msra.mxu0 %v3096_v56  ;;  %4439 = vmatprep.mubr.msk.f32.mxu0 %vm4690_vm4, %v4689_v47 }
 0x98b   : > { %4437 = vmatprep.subr.mxu0 %v4689_v47  ;;  %4460 = vmatprep.subr.mxu1 %v3346_v29 }
 0x98c   : > { %4438 = vmatpush3.msra.mxu0 %v3094_v59  ;;  %4461 = vmatpush3.msra.mxu1 %v3346_v29  ;;  %v4616_v59 = vld [vmem:[#allocation2 + $0x8] sm:$0xff] }
 0x98d   : > { %4449 = vmatprep.subr.mxu0 %v4689_v47  ;;  %4440 = vmatmul.mubr.msk.f32.vlgmr.msra.gmra.mxu0 %vm2603_vm6, %v2689_v17  ;;  %v3591_v17 = vld [vmem:[%s4902_s24 + $0x60] sm:$0xff] }
 0x98e   : > { %4450 = vmatpush3.msra.mxu0 %v5219_v61  ;;  %4453 = vmatprep.mubr.msk.f32.mxu0 %vm4690_vm4, %v4689_v47 }
 0x98f   : > { %4451 = vmatprep.subr.mxu0 %v4689_v47  ;;  %4462 = vmatprep.subr.mxu1 %v3345_v32 }
 0x990   : > { %4452 = vmatpush3.msra.mxu0 %v3252_v19  ;;  %4463 = vmatpush3.msra.mxu1 %v3345_v32  ;;  %v3589_v19 = vld [vmem:[%s4902_s24 + $0x50] sm:$0xff] }
 0x991   : > { %4454 = vmatmul.mubr.msk.f32.vlgmr.msra.gmra.mxu0 %vm2603_vm6, %v2691_v20  ;;  %4467 = vmatprep.subr.mxu0 %v3486_v11  ;;  %v3588_v20 = vld [vmem:[%s4902_s24 + $0x48] sm:$0xff] }
 0x992   : > { %4468 = vmatpush3.msra.mxu0 %v3486_v11  ;;  %4478 = vmatprep.subr.mxu1 %v3594_v14 }
 0x993   : > { %4469 = vmatprep.subr.mxu0 %v3485_v12 }
 0x994   : > { %4470 = vmatpush3.msra.mxu0 %v3485_v12 }
 0x995   : > { %4471 = vmatprep.subr.mxu0 %v3484_v44 }
 0x996   : > { %4472 = vmatpush3.msra.mxu0 %v3484_v44 }
 0x997   : > { %4473 = vmatprep.subr.mxu0 %v3483_v13 }
 0x998   : > { %4474 = vmatpush3.msra.mxu0 %v3483_v13 }
 0xa3b   : > { %v3088_v21 = vpop.f32.mrf.mxu1 }
 0xa3c   : > { %v2761_v22 = vpop.f32.mrf.mxu0 }
 0xa3d   : > { %v4434_v23 = vpop.f32.mrf.mxu1 }
 0xa3e   : > { %v4406_v24 = vpop.f32.mrf.mxu0  ;;  %v3585_v23 = vld [vmem:[%s4902_s24 + $0x30] sm:$0xff] }
 0xa3f   : > { %v3584_v24 = vld [vmem:[%s4902_s24 + $0x28] sm:$0xff] }
 0xa41   : > { %v3247_v26 = vpop.f32.mrf.mxu1  ;;  %v2841_v27 = vpop.f32.mrf.mxu0 }
 0xa42   : > { %3004 = vrot.lane.b32.xlu0 %v2841_v27, %s4694_s21 }
 0xa43   : > { %v4448_v47 = vpop.f32.mrf.mxu1  ;;  %v4413_v30 = vpop.f32.mrf.mxu0 }
 0xa45   : > { %v2920_v31 = vpop.f32.mrf.mxu0 }
 0xa46   : > { %3008 = vrot.lane.b32.xlu1 %v2920_v31, %s4695_s12  ;;  %v4136_v31 = vld [vmem:[%s1142_s14] ss:$0 sm:$0xff] }
 0xa47   : > { %v4420_v33 = vpop.f32.mrf.mxu0 }
 0xa48   : > { %v4137_v33 = vld [vmem:[%s5416_s19] ss:$0 sm:$0xff] }
 0xa49   : > { %v2999_v34 = vpop.f32.mrf.mxu0 }
 0xa4a   : > { %3012 = vrot.lane.b32.xlu1 %v2999_v34, %s4696_s22 }
 0xa4b   : > { %v4427_v35 = vpop.f32.mrf.mxu0 }
 0xa4d   : > { %v3168_v36 = vpop.f32.mrf.mxu0 }
 0xa4e   : > { %3331 = vrot.lane.b32.xlu0 %v3168_v36, %s4694_s21 }
 0xa4f   : > { %v4441_v37 = vpop.f32.mrf.mxu0 }
 0xa51   : > { %v3326_v38 = vpop.f32.mrf.mxu0 }
 0xa52   : > { %3335 = vrot.lane.b32.xlu0 %v3247_v26, %s4695_s12  ;;  %3339 = vrot.lane.b32.xlu1 %v3326_v38, %s4696_s22 }
 0xa53   : > { %v4455_v39 = vpop.f32.mrf.mxu0 }
 0xab4   : > { %v3005_v40 = vpop.permute.xlu0 %3004 }
 0xab5   : > { %v3015_v43 = vsel %vm1923_vm5, %v2761_v22, %v3005_v40  ;;  %v3586_v22 = vld [vmem:[%s4902_s24 + $0x38] sm:$0xff]  ;;  %v3583_v40 = vld [vmem:[%s4902_s24 + $0x20] sm:$0xff] }
 0xab8   : > { %v3009_v41 = vpop.permute.xlu1 %3008 }
 0xab9   : > { %v3016_v45 = vsel %vm2603_vm6, %v3015_v43, %v3009_v41  ;;  %v3582_v41 = vld [vmem:[%s4902_s24 + $0x18] sm:$0xff]  ;;  %v3581_v43 = vld [vmem:[%s4902_s24 + $0x10] sm:$0xff] }
 0xabc   : > { %v3013_v46 = vpop.permute.xlu1 %3012 }
 0xabd   : > { %v3018_v48 = vsel %vm3017_vm7, %v3016_v45, %v3013_v46  ;;  %v3580_v45 = vld [vmem:[%s4902_s24 + $0x8] sm:$0xff]  ;;  %v3579_v46 = vld [vmem:[%s4902_s24] sm:$0xff] }
 0xabe   : > { %4464 = vmatprep.mubr.msk.f32.mxu1 %vm1195_vm1, %v3018_v48  ;;  %v4138_v48 = vld [vmem:[%s1153_s23] ss:$0 sm:$0xff] }
 0xac0   : > { %v3332_v49 = vpop.permute.xlu0 %3331 }
 0xac1   : > { %v3342_v50 = vsel %vm1923_vm5, %v3088_v21, %v3332_v49  ;;  %v3587_v21 = vld [vmem:[%s4902_s24 + $0x40] sm:$0xff]  ;;  %s5418_s24 = sld [smem:[#allocation26_spill]] }
 0xac4   : > { %v3336_v51 = vpop.permute.xlu0 %3335  ;;  %v3340_v52 = vpop.permute.xlu1 %3339 }
 0xac5   : > { %v3343_v53 = vsel %vm2603_vm6, %v3342_v50, %v3336_v51 }
 0xac6   : > { %v3344_v54 = vsel %vm3017_vm7, %v3343_v53, %v3340_v52 }
 0xac7   : > { %4465 = vmatmul.mubr.msk.f32.vlgmr.msra.gmra.mxu1 %vm1195_vm1, %v3344_v54  ;;  %p4142_p5 = scmp.ne.s32.totalorder %s5418_s24, 1 }
 0xac8   : > { %4479 = vmatpush3.msra.mxu1 %v3594_v14  ;;  %s5419_s10 = sld [smem:[#allocation13_spill]] (!%p4142_p5) }
 0xac9   : > { %4480 = vmatprep.subr.mxu1 %v3593_v15  ;;  %s5420_s0 = sld [smem:[#allocation14_spill]] (!%p4142_p5) }
 0xaca   : > { %4481 = vmatpush3.msra.mxu1 %v3593_v15 }
 0xacb   : > { %4482 = vmatprep.subr.mxu1 %v3592_v16 }
 0xacc   : > { %4483 = vmatpush3.msra.mxu1 %v3592_v16 }
 0xacd   : > { %4484 = vmatprep.subr.mxu1 %v3591_v17 }
 0xace   : > { %4485 = vmatpush3.msra.mxu1 %v3591_v17 }
 0xacf   : > { %4486 = vmatprep.subr.mxu1 %v3590_v18 }
 0xad0   : > { %4487 = vmatpush3.msra.mxu1 %v3590_v18 }
 0xad1   : > { %4488 = vmatprep.subr.mxu1 %v3589_v19 }
 0xad2   : > { %4489 = vmatpush3.msra.mxu1 %v3589_v19 }
 0xad3   : > { %4490 = vmatprep.subr.mxu1 %v3588_v20 }
 0xad4   : > { %4491 = vmatpush3.msra.mxu1 %v3588_v20 }
 0xad5   : > { %4492 = vmatprep.subr.mxu1 %v3587_v21 }
 0xad6   : > { %4493 = vmatpush3.msra.mxu1 %v3587_v21 }
 0xad7   : > { %4494 = vmatprep.subr.mxu1 %v3586_v22 }
 0xad8   : > { %4495 = vmatpush3.msra.mxu1 %v3586_v22 }
 0xad9   : > { %4496 = vmatprep.subr.mxu1 %v3585_v23 }
 0xada   : > { %4497 = vmatpush3.msra.mxu1 %v3585_v23 }
 0xadb   : > { %4498 = vmatprep.subr.mxu1 %v3584_v24 }
 0xadc   : > { %4499 = vmatpush3.msra.mxu1 %v3584_v24 }
 0xadd   : > { %4500 = vmatprep.subr.mxu1 %v3583_v40 }
 0xade   : > { %4501 = vmatpush3.msra.mxu1 %v3583_v40 }
 0xadf   : > { %4502 = vmatprep.subr.mxu1 %v3582_v41 }
 0xae0   : > { %4503 = vmatpush3.msra.mxu1 %v3582_v41 }
 0xae1   : > { %4504 = vmatprep.subr.mxu1 %v3581_v43 }
 0xae2   : > { %4505 = vmatpush3.msra.mxu1 %v3581_v43 }
 0xae3   : > { %4506 = vmatprep.subr.mxu1 %v3580_v45 }
 0xae4   : > { %4507 = vmatpush3.msra.mxu1 %v3580_v45 }
 0xae5   : > { %4508 = vmatprep.subr.mxu1 %v3579_v46 }
 0xae6   : > { %4509 = vmatpush3.msra.mxu1 %v3579_v46 }
 0xb87   : > { %v4466_v56 = vpop.f32.mrf.mxu1 }
 0xb88   : > { %v3434_v57 = vadd.f32 %v4466_v56, %v4133_v55 }
 0xb89   : > { %v3428_v58 = vpop.f32.mrf.mxu1 }
 0xb8a   : > { %v5273_v60 = vadd.f32 %v4616_v59, %v3434_v57  ;;  %v3429_v61 = vadd.f32 %v4133_v55, %v3428_v58  ;;  %v4141_v57 = vld [vmem:[%s1161_s26] ss:$0 sm:$0xff] }
 0xb8c   : > { %v5275_v63 = vadd.f32 %v4617_v62, %v3429_v61  ;;  %v3444_v0 = vsel %vm1195_vm1, %v5273_v60, 0.0 }
 0xb8d   : > { %3445 = vadd.xlane.f32.xlu1 %v3444_v0 }
 0xb8e   : > { %v3441_v1 = vsel %vm1195_vm1, %v5275_v63, 0.0 }
 0xb8f   : > { %3442 = vadd.xlane.f32.xlu0 %v3441_v1 }
 0xc16   : > { %v3446_v2 = vpop.xlane.xlu1 %3445 }
 0xc17   : > { %v3448_v3 = vmul.f32 0.03125, %v3446_v2 }
 0xc18   : > { %v3443_v4 = vpop.xlane.xlu0 %3442 }
 0xc19   : > { %v3447_v5 = vmul.f32 0.03125, %v3443_v4  ;;  %v5282_v6 = vsub.f32 %v5273_v60, %v3448_v3 }
 0xc1b   : > { %v3449_v7 = vsub.f32 %v5275_v63, %v3447_v5  ;;  %v3452_v9 = vmul.f32 %v5282_v6, %v5282_v6 }
 0xc1d   : > { %v3451_v42 = vmul.f32 %v3449_v7, %v3449_v7  ;;  %v3456_v10 = vsel %vm1195_vm1, %v3452_v9, 0.0 }
 0xc1f   : > { %v3453_v8 = vsel %vm1195_vm1, %v3451_v42, 0.0 }
 0xc20   : > { %3454 = vadd.xlane.f32.xlu0 %v3453_v8 }
 0xc24   : > { %3457 = vadd.xlane.f32.xlu0 %v3456_v10 }
 0xca9   : > { %v3455_v25 = vpop.xlane.xlu0 %3454 }
 0xcaa   : > { %v3459_v26 = vmul.f32 0.03125, %v3455_v25 }
 0xcac   : > { %v3461_v27 = vadd.f32 1e-05, %v3459_v26 }
 0xcad   : > { %v3458_v28 = vpop.xlane.xlu0 %3457 }
 0xcae   : > { %4612 = vrsqrt.f32 %v3461_v27  ;;  %v3460_v29 = vmul.f32 0.03125, %v3458_v28 }
 0xcb0   : > { %v3462_v47 = vadd.f32 1e-05, %v3460_v29 }
 0xcb2   : > { %4614 = vrsqrt.f32 %v3462_v47 }
 0xcbb   : > { %v4613_v30 = vpop.eup %4612 }
 0xcbc   : > { %v3465_v32 = vmul.f32 %v4613_v30, %v3449_v7 }
 0xcbe   : > { %v3473_v34 = vmul.f32 %v4136_v31, %v3465_v32 }
 0xcbf   : > { %v4615_v35 = vpop.eup %4614 }
 0xcc0   : > { %v3466_v36 = vmul.f32 %v4615_v35, %v5282_v6  ;;  %v3481_v37 = vadd.f32 %v4137_v33, %v3473_v34 }
 0xcc2   : > { %v3474_v38 = vmul.f32 %v4136_v31, %v3466_v36  ;;  %4475 = vmatprep.mubr.msk.f32.mxu0 %vm1195_vm1, %v3481_v37 }
 0xcc4   : > { %v3482_v39 = vadd.f32 %v4137_v33, %v3474_v38 }
 0xcc6   : > { %4476 = vmatmul.mubr.msk.f32.vlgmr.msra.gmra.mxu0 %vm1195_vm1, %v3482_v39 }
 0xd86   : > { %v4477_v49 = vpop.f32.mrf.mxu0 }
 0xd87   : > { %v3572_v50 = vadd.f32 %v4477_v49, %v4138_v48 }
 0xd88   : > { %v3566_v51 = vpop.f32.mrf.mxu0 }
 0xd89   : > { %v3567_v52 = vadd.f32 %v4138_v48, %v3566_v51  ;;  %v3576_v53 = vmax.f32 %v3572_v50, 0.0 }
 0xd8b   : > { %v3575_v54 = vmax.f32 %v3567_v52, 0.0  ;;  %v3578_v56 = vmul.f32 %v3576_v53, %v3576_v53 }
 0xd8d   : > { %v3577_v55 = vmul.f32 %v3575_v54, %v3575_v54 }
 0xd8f   : > { %4510 = vmatprep.mubr.f32.mxu1 %v3577_v55 }
 0xd90   : > { %4511 = vmatmul.mubr.f32.vlgmr.msra.gmra.mxu1 %v3578_v56 }
 0xe50   : > { %v4512_v58 = vpop.f32.mrf.mxu1 }
 0xe51   : > { %v3674_v59 = vadd.f32 %v4512_v58, %v4141_v57 }
 0xe52   : > { %v3668_v61 = vpop.f32.mrf.mxu1 }
 0xe53   : > { %v3678_v62 = vadd.f32 %v3674_v59, %v5273_v60  ;;  %v3669_v0 = vadd.f32 %v4141_v57, %v3668_v61  ;;  %3684 = sbr.rel (%p4142_p5) target bundleno = 3985 (0xf91), region = 136 }
 0xe55   : > { %3680 = vst.msk [vmem:[#allocation2 + $0x8] sm:$0xff] %vm1195_vm1, %v3678_v62  ;;  %v3677_v1 = vadd.f32 %v3669_v0, %v5275_v63 }
 0xe57   : > { %3679 = vst.msk [vmem:[#allocation2] sm:$0xff] %vm1195_vm1, %v3677_v1 }
 0xe58   : > { %v3687_v2 = vsel %vm1195_vm1, %v3677_v1, 0.0  ;;  %v3690_v3 = vsel %vm1195_vm1, %v3678_v62, 0.0  ;;  %v4143_v17 = vld [vmem:[%s5419_s10] ss:$0 sm:$0xff] }
 0xe59   : > { %3688 = vadd.xlane.f32.xlu0 %v3687_v2  ;;  %v4144_v19 = vld [vmem:[%s5420_s0] ss:$0 sm:$0xff] }
 0xe5d   : > { %3691 = vadd.xlane.f32.xlu0 %v3690_v3 }
 0xee2   : > { %v3689_v4 = vpop.xlane.xlu0 %3688 }
 0xee3   : > { %v3693_v5 = vmul.f32 0.03125, %v3689_v4 }
 0xee5   : > { %v3695_v6 = vsub.f32 %v3677_v1, %v3693_v5 }
 0xee6   : > { %v3692_v60 = vpop.xlane.xlu0 %3691 }
 0xee7   : > { %v3694_v7 = vmul.f32 0.03125, %v3692_v60  ;;  %v3697_v42 = vmul.f32 %v3695_v6, %v3695_v6 }
 0xee9   : > { %v3696_v8 = vsub.f32 %v3678_v62, %v3694_v7  ;;  %v3699_v63 = vsel %vm1195_vm1, %v3697_v42, 0.0 }
 0xeea   : > { %3700 = vadd.xlane.f32.xlu1 %v3699_v63 }
 0xeeb   : > { %v3698_v9 = vmul.f32 %v3696_v8, %v3696_v8 }
 0xeed   : > { %v3702_v10 = vsel %vm1195_vm1, %v3698_v9, 0.0 }
 0xeee   : > { %3703 = vadd.xlane.f32.xlu1 %v3702_v10 }
 0xf73   : > { %v3701_v11 = vpop.xlane.xlu1 %3700 }
 0xf74   : > { %v3705_v12 = vmul.f32 0.03125, %v3701_v11 }
 0xf76   : > { %v3707_v44 = vadd.f32 1e-05, %v3705_v12 }
 0xf77   : > { %v3704_v13 = vpop.xlane.xlu1 %3703 }
 0xf78   : > { %4618 = vrsqrt.f32 %v3707_v44  ;;  %v3706_v14 = vmul.f32 0.03125, %v3704_v13 }
 0xf7a   : > { %v3708_v15 = vadd.f32 1e-05, %v3706_v14 }
 0xf7c   : > { %4620 = vrsqrt.f32 %v3708_v15 }
 0xf85   : > { %v4619_v16 = vpop.eup %4618 }
 0xf86   : > { %v3711_v18 = vmul.f32 %v4619_v16, %v3695_v6 }
 0xf88   : > { %v3719_v20 = vmul.f32 %v4143_v17, %v3711_v18 }
 0xf89   : > { %v4621_v21 = vpop.eup %4620 }
 0xf8a   : > { %v3727_v22 = vadd.f32 %v4144_v19, %v3719_v20  ;;  %v3712_v23 = vmul.f32 %v4621_v21, %v3696_v8 }
 0xf8c   : > { %3729 = vst.msk [vmem:[#allocation3] sm:$0xff] %vm1195_vm1, %v3727_v22  ;;  %v3720_v24 = vmul.f32 %v4143_v17, %v3712_v23 }
 0xf8e   : > { %v3728_v25 = vadd.f32 %v4144_v19, %v3720_v24 }
 0xf90   : > { %3730 = vst.msk [vmem:[#allocation3 + $0x8] sm:$0xff] %vm1195_vm1, %v3728_v25 }
 0xf91 PF: > { %s5421_s11 = sld [smem:[#allocation26_spill]]  ;;  %s4697_s23 = smov [#allocation3]  }
 0xf92   : > { %s3747_s26 = sshll.u32 %s4697_s23, 4  ;;  %s3748_s26 = int_to_ptr.vmem [resolvable:$true] %s3747_s26 }
 0xf93   : > { %s4622_s2 = scalar_lea.vmem %s3748_s26, 256  ;;  %p4629_p10 = scmp.lt.s32.totalorder %s3748_s26, %s3748_s26 }
 0xf94   : > { %p4623_p7 = scmp.ne.s32.totalorder %s3748_s26, %s4622_s2  ;;  %p4630_p11 = scmp.lt.s32.totalorder %s4622_s2, %s4622_s2 }
 0xf96   : > { %p4631_p12 = por %p4630_p11, %p4629_p10 }
 0xf97   : > { %p4517_p6 = scmp.eq.s32.totalorder %s5421_s11, 1 }
 0xf99   : > { %p4624_p8 = pnand %p4623_p7, %p4517_p6 }
 0xf9b   : > { %p4625_p9 = pneg %p4624_p8 }
 0xf9d   : > { %p4632_p13 = pnand %p4631_p12, %p4625_p9 }
 0xf9f   : > { %4635 = shalt.err (!%p4632_p13)
}
 0xfa0   : > { %s4698_s1 = smov 128   ;;  %s5422_s7 = sld [smem:[#allocation24_spill]] }
 0xfa6   : > { %4514 = dma.vmem_to_hbm [thread:$0]  (%p4517_p6), %s3748_s26, 256, %s5422_s7, [#allocation4], %s4698_s1, %s4698_s1, %s4694_s21  }
 0xfa7   : > { %4651 = dma.done.wait (%p4517_p6), [#allocation4], 256  }
 0xfa8   : > { %4653 = vsyncadd (%p4517_p6), [#allocation4], 4294967040 }
 0xfa9 PF: > { %s5423_s12 = sld [smem:[#allocation25_spill]] }
 0xfaf   : > { %s71_s7 = sadd.s32 1, %s5423_s12  }
 0xfb0   : > { %p68_p0 = scmp.ge.s32.totalorder %s71_s7, 4  }
 0xfb2   :  { %70 = sbr.rel (!%p68_p0) target bundleno = 56 (0x38), region = 271 }
 0xfb7   :  { %3785 = vsyncpa [#allocation4], 1 }
 0xfb8   :  { %3787 = vsyncpa [#allocation4 + $0x1], 1 }

</bundles_post_ra>
